<compile_context>
chip_gen: v5e
topology: v5e:2x2
jax: 0.10.0
libtpu: 0.0.40
codegen_flags: <defaults>
</compile_context>

<pallas_src>
import functools

import numpy as np
import jax
import jax.numpy as jnp
from jax.experimental import pallas as pl
from jax.experimental.pallas import tpu as pltpu


def position_loss_kernel(kslab_ref, sslab_ref, out_ref, *, down_ratio, kps_num):
    # ---- unpack slabs (static slices; leading-axis index on kslab is free) ----
    kpsx = kslab_ref[0]                      # (N, K)
    kpsy = kslab_ref[1]
    cx = kslab_ref[2]
    cy = kslab_ref[3]
    cz = kslab_ref[4]

    s = sslab_ref[...]                       # (N, 32)
    l = s[:, 0:1]
    h = s[:, 1:2]
    w = s[:, 2:3]
    rot = s[:, 3:4]
    cenx = s[:, 4:5]
    ceny = s[:, 5:6]
    padx = s[:, 6:7]
    pady = s[:, 7:8]
    f = s[:, 8:9]
    ccx = s[:, 9:10]
    ccy = s[:, 10:11]
    gtc = s[:, 11:14]                        # (N, 3)
    gtp = s[:, 14:32]                        # (N, 18) = 6 planes x 3

    # ---- kps -> image coords -> normalized camera coords (one (N,K) pass) ----
    inv_f = 1.0 / f                          # single (N,1) reciprocal instead of 2x (N,K) divides
    kpx = ((kpsx + cenx) * down_ratio - padx - ccx) * inv_f     # (N, K)
    kpy = ((kpsy + ceny) * down_ratio - pady - ccy) * inv_f

    cosori = jnp.cos(rot)                    # (N, 1)
    sinori = jnp.sin(rot)

    # ---- variant-invariant normal matrix M = A^T A and its inverse (hoisted) ----
    #   A rows: [-1, 0, kpx_i], [0, -1, kpy_i]
    #   M = [[K, 0, M02], [0, K, M12], [M02, M12, M22]]
    Kf = jnp.float32(kps_num)
    M02 = -jnp.sum(kpx, axis=1, keepdims=True)                  # (N, 1)
    M12 = -jnp.sum(kpy, axis=1, keepdims=True)
    M22 = jnp.sum(kpx * kpx + kpy * kpy, axis=1, keepdims=True)

    det = Kf * (Kf * M22 - M12 * M12 - M02 * M02)
    inv_det = 1.0 / det
    c00 = (Kf * M22 - M12 * M12) * inv_det
    c01 = (M02 * M12) * inv_det
    c02 = (-Kf * M02) * inv_det
    c11 = (Kf * M22 - M02 * M02) * inv_det
    c12 = (-Kf * M12) * inv_det
    c22 = (Kf * Kf) * inv_det

    def solve_from_v(v0, v1, v2):
        px = c00 * v0 + c01 * v1 + c02 * v2
        py = c01 * v0 + c11 * v1 + c12 * v2
        pz = c02 * v0 + c12 * v1 + c22 * v2
        return px, py, pz                                       # each (N, 1)

    # ---- base right-hand side v = A^T B (the only full (N,K) B pass) ----
    #   B0 = l*cx*cos + w*cz*sin ; B1 = h*cy ; C0 = -l*cx*sin + w*cz*cos
    B0 = l * cx * cosori + w * cz * sinori
    B1 = h * cy
    C0 = w * cz * cosori - l * cx * sinori
    Bx = B0 - kpx * C0
    By = B1 - kpy * C0
    v0 = -jnp.sum(Bx, axis=1, keepdims=True)
    v1 = -jnp.sum(By, axis=1, keepdims=True)
    v2 = jnp.sum(kpx * Bx + kpy * By, axis=1, keepdims=True)

    # ---- center loss (box coef) ----
    px, py, pz = solve_from_v(v0, v1, v2)
    dxc = px - gtc[:, 0:1]
    dyc = py - gtc[:, 1:2]
    dzc = pz - gtc[:, 2:3]
    loss_norm = jnp.sqrt(dxc * dxc + dyc * dyc + dzc * dzc)     # (N, 1)
    mask_num = jnp.sum((loss_norm != 0.0).astype(jnp.float32), axis=0, keepdims=True)
    loss = jnp.sum(loss_norm, axis=0, keepdims=True) / (mask_num + 1.0)   # (1, 1)

    # ---- plane losses via closed-form deltas of v (no per-variant (N,K) work) ----
    # Shifting coef channel by d changes:
    #   B0 += a ,  B1 += b ,  C0 += c   with (N,1) scalars
    #     dx: a =  dx*l*cos, c = -dx*l*sin
    #     dy: b =  dy*h
    #     dz: a =  dz*w*sin, c =  dz*w*cos
    # =>  v0' = v0 - K*a - c*M02 ; v1' = v1 - K*b - c*M12 ; v2' = v2 - a*M02 - b*M12 - c*M22
    half_lcos = 0.5 * l * cosori
    half_lsin = 0.5 * l * sinori
    half_h = 0.5 * h
    half_wsin = 0.5 * w * sinori
    half_wcos = 0.5 * w * cosori

    def plane_xyz(a=None, b=None, c=None):
        nv0, nv1, nv2 = v0, v1, v2
        if a is not None:
            nv0 = nv0 - Kf * a
            nv2 = nv2 - a * M02
        if b is not None:
            nv1 = nv1 - Kf * b
            nv2 = nv2 - b * M12
        if c is not None:
            nv0 = nv0 - c * M02
            nv1 = nv1 - c * M12
            nv2 = nv2 - c * M22
        return solve_from_v(nv0, nv1, nv2)

    # order matches torch: back(+x), front(-x), bottom(-y), top(+y), right(-z), left(+z)
    variants = [
        (half_lcos, None, -half_lsin),     # back   (dx = +0.5)
        (-half_lcos, None, half_lsin),     # front  (dx = -0.5)
        (None, -half_h, None),             # bottom (dy = -0.5)
        (None, half_h, None),              # top    (dy = +0.5)
        (-half_wsin, None, -half_wcos),    # right  (dz = -0.5)
        (half_wsin, None, half_wcos),      # left   (dz = +0.5)
    ]
    plane_sum = jnp.zeros_like(loss_norm)                       # (N, 1)
    for i, (a, b, c) in enumerate(variants):
        ppx, ppy, ppz = plane_xyz(a, b, c)
        dpx = ppx - gtp[:, 3 * i + 0:3 * i + 1]
        dpy = ppy - gtp[:, 3 * i + 1:3 * i + 2]
        dpz = ppz - gtp[:, 3 * i + 2:3 * i + 3]
        # L2 over xyz; L1 over planes == running sum of non-negative norms
        plane_sum = plane_sum + jnp.sqrt(dpx * dpx + dpy * dpy + dpz * dpz)

    plane_mask_num = jnp.sum((plane_sum != 0.0).astype(jnp.float32),
                             axis=0, keepdims=True)
    plane_loss = jnp.sum(plane_sum, axis=0, keepdims=True) / (plane_mask_num + 1.0)

    total = loss + plane_loss                                   # (1, 1)
    total = jnp.where(jnp.isnan(total), jnp.zeros_like(total), total)
    total = jnp.where(jnp.isinf(total), jnp.ones_like(total), total)
    out_ref[...] = total


def position_loss(pred, target, output_w, down_ratio):
    """Pallas wrapper reproducing Position_loss.forward (weight_flag=False)."""
    kps = pred['keypoints'].astype(jnp.float32)                   # (N, K, 2)
    dims = pred['dims_3D'].astype(jnp.float32)                    # (N, 3)
    rot = pred['rotys_3D'].astype(jnp.float32).reshape(-1, 1)     # (N, 1)
    coef = target['coef'].astype(jnp.float32)                     # (N, K, 3)
    calib = target['calib'].astype(jnp.float32)                   # (N, 3, 4)
    idx = target['center_points_index'].astype(jnp.float32)       # (N,)
    gtc = target['3D_center'].astype(jnp.float32)                 # (N, 3)
    gtp = target['3D_plane_center'].astype(jnp.float32)           # (N, 6, 3)
    N, K, _ = kps.shape

    # glue: center point from flat index, calib slices, pad broadcast
    cys = jnp.floor(idx / output_w).reshape(N, 1)
    cxs = jnp.floor(idx % output_w).reshape(N, 1)
    pad = jnp.broadcast_to(target['image_pad_size'].astype(jnp.float32),
                           (N, 1, 2)).reshape(N, 2)               # (N, 2)
    f = calib[:, 0, 0].reshape(N, 1)                              # (N, 1)
    ccx = calib[:, 0, 2].reshape(N, 1)
    ccy = calib[:, 1, 2].reshape(N, 1)

    # Pack everything into two lane-friendly slabs -> 2 DMAs instead of 13.
    slab_k = jnp.stack([kps[:, :, 0], kps[:, :, 1],
                        coef[:, :, 0], coef[:, :, 1], coef[:, :, 2]], axis=0)  # (5, N, K)
    slab_s = jnp.concatenate([
        dims,                  # cols 0..2   l, h, w
        rot,                   # col  3      rot_y
        cxs, cys,              # cols 4, 5   center point
        pad,                   # cols 6, 7   pad x/y
        f,                     # col  8      focal
        ccx, ccy,              # cols 9, 10  principal point
        gtc,                   # cols 11..13 gt 3D center
        gtp.reshape(N, 18),    # cols 14..31 gt plane centers (6 x 3)
    ], axis=1)                                                    # (N, 32)

    kernel = functools.partial(position_loss_kernel,
                               down_ratio=float(down_ratio), kps_num=K)
    vmem = pl.BlockSpec(memory_space=pltpu.MemorySpace.VMEM)
    out = pl.pallas_call(
        kernel,
        out_shape=jax.ShapeDtypeStruct((1, 1), jnp.float32),
        in_specs=[vmem, vmem],
        out_specs=vmem,
    )(slab_k, slab_s)
    return out[0, 0]


def position_loss_ref(pred, target, output_w, down_ratio):
    """Pure-JAX reference mirroring the torch module (explicit A/B + solve)."""
    kps = pred['keypoints'].astype(jnp.float32)
    dims = pred['dims_3D'].astype(jnp.float32)
    rot = pred['rotys_3D'].astype(jnp.float32)
    coef = target['coef'].astype(jnp.float32)
    calib = target['calib'].astype(jnp.float32)
    idx = target['center_points_index'].astype(jnp.float32)
    pad = target['image_pad_size'].astype(jnp.float32)
    gtc = target['3D_center'].astype(jnp.float32)
    gtp = target['3D_plane_center'].astype(jnp.float32)
    N, K, _ = kps.shape

    cys = jnp.floor(idx / output_w)
    cxs = jnp.floor(idx % output_w)
    cen = jnp.stack([cxs, cys], axis=1)[:, None, :]
    kps_img = (kps + cen) * down_ratio - pad
    f = calib[:, 0, 0][:, None, None]
    cxy = jnp.stack([calib[:, 0, 2], calib[:, 1, 2]], axis=1)[:, None, :]
    kp_norm = (kps_img - cxy) / f                                  # (N, K, 2)

    const = jnp.tile(jnp.array([[-1., 0.], [0., -1.]], jnp.float32), (K, 1))
    A = jnp.concatenate([jnp.broadcast_to(const[None], (N, 2 * K, 2)),
                         kp_norm.reshape(N, 2 * K, 1)], axis=2)

    l, h, w = dims[:, 0:1], dims[:, 1:2], dims[:, 2:3]
    c, s = jnp.cos(rot)[:, None], jnp.sin(rot)[:, None]

    def svd(cf):
        B0 = l * cf[:, :, 0] * c + w * cf[:, :, 2] * s
        B1 = h * cf[:, :, 1]
        C0 = -l * cf[:, :, 0] * s + w * cf[:, :, 2] * c
        B = jnp.stack([B0, B1], 2) - kp_norm * jnp.stack([C0, C0], 2)
        B = B.reshape(N, 2 * K, 1)
        AT = jnp.swapaxes(A, 1, 2)
        return jnp.linalg.solve(AT @ A, AT @ B)[:, :, 0]

    def shift(ch, d):
        return coef.at[:, :, ch].add(d)

    pinv = svd(coef)
    planes = jnp.stack([svd(shift(0, 0.5)), svd(shift(0, -0.5)),
                        svd(shift(1, -0.5)), svd(shift(1, 0.5)),
                        svd(shift(2, -0.5)), svd(shift(2, 0.5))], axis=1)

    ln = jnp.linalg.norm(pinv - gtc, axis=1)
    loss = ln.sum() / (jnp.sum(ln != 0) + 1)
    pn = jnp.linalg.norm(planes - gtp, axis=2).sum(axis=1)
    ploss = pn.sum() / (jnp.sum(pn != 0) + 1)
    total = loss + ploss
    total = jnp.where(jnp.isnan(total), 0.0, total)
    total = jnp.where(jnp.isinf(total), 1.0, total)
    return total


if __name__ == "__main__":
    key = jax.random.PRNGKey(0)
    N, K = 8, 10
    output_w, down_ratio = 320, 4
    ks = jax.random.split(key, 8)

    kps = jax.random.normal(ks[0], (N, K, 2), jnp.float32) * 8.0
    dims = jax.random.uniform(ks[1], (N, 3), jnp.float32, minval=1.0, maxval=4.0)
    rot = jax.random.uniform(ks[2], (N,), jnp.float32, minval=-3.1, maxval=3.1)
    coef = jnp.where(jax.random.bernoulli(ks[3], 0.5, (N, K, 3)), 0.5, -0.5
                     ).astype(jnp.float32)
    idx = jax.random.randint(ks[4], (N,), 0, output_w * 96).astype(jnp.float32)
    pad = jnp.tile(jnp.array([[[6.0, 4.0]]], jnp.float32), (N, 1, 1))   # (N,1,2)
    f_val = 700.0 + 10.0 * jax.random.normal(ks[5], (N,), jnp.float32)
    calib = jnp.zeros((N, 3, 4), jnp.float32)
    calib = calib.at[:, 0, 0].set(f_val).at[:, 1, 1].set(f_val)
    calib = calib.at[:, 0, 2].set(640.0).at[:, 1, 2].set(192.0).at[:, 2, 2].set(1.0)
    gt_c = jax.random.normal(ks[6], (N, 3), jnp.float32) * 5.0
    gt_p = jax.random.normal(ks[7], (N, 6, 3), jnp.float32) * 5.0

    pred = {'keypoints': kps, 'dims_3D': dims, 'rotys_3D': rot}
    target = {'3D_center': gt_c, '3D_plane_center': gt_p, 'coef': coef,
              'calib': calib, 'image_pad_size': pad,
              'center_points_index': idx,
              'occlusions': jnp.zeros((N,), jnp.float32)}   # present but unused (as in torch forward)

    out = jax.block_until_ready(position_loss(pred, target, output_w, down_ratio))
    ref = jax.block_until_ready(position_loss_ref(pred, target, output_w, down_ratio))
    np.testing.assert_allclose(np.array(out), np.array(ref), rtol=2e-2, atol=1e-2)
    print("KERNEL_OK")
</pallas_src>

<mosaic_0001>
module attributes {stable_mosaic.version = 11 : i64} {
  func.func @position_loss_kernel(%arg0: memref<5x8x10xf32, #tpu.memory_space<vmem>>, %arg1: memref<8x32xf32, #tpu.memory_space<vmem>>, %arg2: memref<1x1xf32, #tpu.memory_space<vmem>>) attributes {dimension_semantics = [], scalar_prefetch = 0 : i64, scratch_operands = 0 : i64, tpu.core_type = #tpu.core_type<tc>} {
    %c0 = arith.constant 0 : index
    %c0_0 = arith.constant 0 : index
    %c0_1 = arith.constant 0 : index
    %0 = vector.load %arg0[%c0, %c0_0, %c0_1] : memref<5x8x10xf32, #tpu.memory_space<vmem>>, vector<1x8x10xf32>
    %1 = vector.shape_cast %0 : vector<1x8x10xf32> to vector<8x10xf32>
    %c1 = arith.constant 1 : index
    %c0_2 = arith.constant 0 : index
    %c0_3 = arith.constant 0 : index
    %2 = vector.load %arg0[%c1, %c0_2, %c0_3] : memref<5x8x10xf32, #tpu.memory_space<vmem>>, vector<1x8x10xf32>
    %3 = vector.shape_cast %2 : vector<1x8x10xf32> to vector<8x10xf32>
    %c2 = arith.constant 2 : index
    %c0_4 = arith.constant 0 : index
    %c0_5 = arith.constant 0 : index
    %4 = vector.load %arg0[%c2, %c0_4, %c0_5] : memref<5x8x10xf32, #tpu.memory_space<vmem>>, vector<1x8x10xf32>
    %5 = vector.shape_cast %4 : vector<1x8x10xf32> to vector<8x10xf32>
    %c3 = arith.constant 3 : index
    %c0_6 = arith.constant 0 : index
    %c0_7 = arith.constant 0 : index
    %6 = vector.load %arg0[%c3, %c0_6, %c0_7] : memref<5x8x10xf32, #tpu.memory_space<vmem>>, vector<1x8x10xf32>
    %7 = vector.shape_cast %6 : vector<1x8x10xf32> to vector<8x10xf32>
    %c4 = arith.constant 4 : index
    %c0_8 = arith.constant 0 : index
    %c0_9 = arith.constant 0 : index
    %8 = vector.load %arg0[%c4, %c0_8, %c0_9] : memref<5x8x10xf32, #tpu.memory_space<vmem>>, vector<1x8x10xf32>
    %9 = vector.shape_cast %8 : vector<1x8x10xf32> to vector<8x10xf32>
    %c0_10 = arith.constant 0 : index
    %c0_11 = arith.constant 0 : index
    %10 = vector.load %arg1[%c0_10, %c0_11] : memref<8x32xf32, #tpu.memory_space<vmem>>, vector<8x32xf32>
    %11 = vector.extract_strided_slice %10 {offsets = [0, 0], sizes = [8, 1], strides = [1, 1]} : vector<8x32xf32> to vector<8x1xf32>
    %12 = vector.extract_strided_slice %10 {offsets = [0, 1], sizes = [8, 1], strides = [1, 1]} : vector<8x32xf32> to vector<8x1xf32>
    %13 = vector.extract_strided_slice %10 {offsets = [0, 2], sizes = [8, 1], strides = [1, 1]} : vector<8x32xf32> to vector<8x1xf32>
    %14 = vector.extract_strided_slice %10 {offsets = [0, 3], sizes = [8, 1], strides = [1, 1]} : vector<8x32xf32> to vector<8x1xf32>
    %15 = vector.extract_strided_slice %10 {offsets = [0, 4], sizes = [8, 1], strides = [1, 1]} : vector<8x32xf32> to vector<8x1xf32>
    %16 = vector.extract_strided_slice %10 {offsets = [0, 5], sizes = [8, 1], strides = [1, 1]} : vector<8x32xf32> to vector<8x1xf32>
    %17 = vector.extract_strided_slice %10 {offsets = [0, 6], sizes = [8, 1], strides = [1, 1]} : vector<8x32xf32> to vector<8x1xf32>
    %18 = vector.extract_strided_slice %10 {offsets = [0, 7], sizes = [8, 1], strides = [1, 1]} : vector<8x32xf32> to vector<8x1xf32>
    %19 = vector.extract_strided_slice %10 {offsets = [0, 8], sizes = [8, 1], strides = [1, 1]} : vector<8x32xf32> to vector<8x1xf32>
    %20 = vector.extract_strided_slice %10 {offsets = [0, 9], sizes = [8, 1], strides = [1, 1]} : vector<8x32xf32> to vector<8x1xf32>
    %21 = vector.extract_strided_slice %10 {offsets = [0, 10], sizes = [8, 1], strides = [1, 1]} : vector<8x32xf32> to vector<8x1xf32>
    %22 = vector.extract_strided_slice %10 {offsets = [0, 11], sizes = [8, 3], strides = [1, 1]} : vector<8x32xf32> to vector<8x3xf32>
    %23 = vector.extract_strided_slice %10 {offsets = [0, 14], sizes = [8, 18], strides = [1, 1]} : vector<8x32xf32> to vector<8x18xf32>
    %cst = arith.constant 1.000000e+00 : f32
    %24 = vector.broadcast %cst : f32 to vector<8x1xf32>
    %25 = arith.divf %24, %19 : vector<8x1xf32>
    %26 = vector.broadcast %15 : vector<8x1xf32> to vector<8x10xf32>
    %27 = arith.addf %1, %26 : vector<8x10xf32>
    %cst_12 = arith.constant 4.000000e+00 : f32
    %28 = vector.broadcast %cst_12 : f32 to vector<8x10xf32>
    %29 = arith.mulf %27, %28 : vector<8x10xf32>
    %30 = vector.broadcast %17 : vector<8x1xf32> to vector<8x10xf32>
    %31 = arith.subf %29, %30 : vector<8x10xf32>
    %32 = vector.broadcast %20 : vector<8x1xf32> to vector<8x10xf32>
    %33 = arith.subf %31, %32 : vector<8x10xf32>
    %34 = vector.broadcast %25 : vector<8x1xf32> to vector<8x10xf32>
    %35 = arith.mulf %33, %34 : vector<8x10xf32>
    %36 = vector.broadcast %16 : vector<8x1xf32> to vector<8x10xf32>
    %37 = arith.addf %3, %36 : vector<8x10xf32>
    %cst_13 = arith.constant 4.000000e+00 : f32
    %38 = vector.broadcast %cst_13 : f32 to vector<8x10xf32>
    %39 = arith.mulf %37, %38 : vector<8x10xf32>
    %40 = vector.broadcast %18 : vector<8x1xf32> to vector<8x10xf32>
    %41 = arith.subf %39, %40 : vector<8x10xf32>
    %42 = vector.broadcast %21 : vector<8x1xf32> to vector<8x10xf32>
    %43 = arith.subf %41, %42 : vector<8x10xf32>
    %44 = vector.broadcast %25 : vector<8x1xf32> to vector<8x10xf32>
    %45 = arith.mulf %43, %44 : vector<8x10xf32>
    %46 = math.cos %14 : vector<8x1xf32>
    %47 = math.sin %14 : vector<8x1xf32>
    %cst_14 = arith.constant dense<0.000000e+00> : vector<8xf32>
    %48 = vector.multi_reduction <add>, %35, %cst_14 [1] : vector<8x10xf32> to vector<8xf32>
    %49 = vector.shape_cast %48 : vector<8xf32> to vector<8x1xf32>
    %cst_15 = arith.constant 0.000000e+00 : f32
    %50 = vector.broadcast %cst_15 : f32 to vector<8x1xf32>
    %51 = arith.subf %50, %49 : vector<8x1xf32>
    %cst_16 = arith.constant dense<0.000000e+00> : vector<8xf32>
    %52 = vector.multi_reduction <add>, %45, %cst_16 [1] : vector<8x10xf32> to vector<8xf32>
    %53 = vector.shape_cast %52 : vector<8xf32> to vector<8x1xf32>
    %cst_17 = arith.constant 0.000000e+00 : f32
    %54 = vector.broadcast %cst_17 : f32 to vector<8x1xf32>
    %55 = arith.subf %54, %53 : vector<8x1xf32>
    %56 = arith.mulf %35, %35 : vector<8x10xf32>
    %57 = arith.mulf %45, %45 : vector<8x10xf32>
    %58 = arith.addf %56, %57 : vector<8x10xf32>
    %cst_18 = arith.constant dense<0.000000e+00> : vector<8xf32>
    %59 = vector.multi_reduction <add>, %58, %cst_18 [1] : vector<8x10xf32> to vector<8xf32>
    %60 = vector.shape_cast %59 : vector<8xf32> to vector<8x1xf32>
    %cst_19 = arith.constant 1.000000e+01 : f32
    %61 = vector.broadcast %cst_19 : f32 to vector<8x1xf32>
    %62 = arith.mulf %61, %60 : vector<8x1xf32>
    %63 = arith.mulf %55, %55 : vector<8x1xf32>
    %64 = arith.subf %62, %63 : vector<8x1xf32>
    %65 = arith.mulf %51, %51 : vector<8x1xf32>
    %66 = arith.subf %64, %65 : vector<8x1xf32>
    %cst_20 = arith.constant 1.000000e+01 : f32
    %67 = vector.broadcast %cst_20 : f32 to vector<8x1xf32>
    %68 = arith.mulf %67, %66 : vector<8x1xf32>
    %cst_21 = arith.constant 1.000000e+00 : f32
    %69 = vector.broadcast %cst_21 : f32 to vector<8x1xf32>
    %70 = arith.divf %69, %68 : vector<8x1xf32>
    %cst_22 = arith.constant 1.000000e+01 : f32
    %71 = vector.broadcast %cst_22 : f32 to vector<8x1xf32>
    %72 = arith.mulf %71, %60 : vector<8x1xf32>
    %73 = arith.mulf %55, %55 : vector<8x1xf32>
    %74 = arith.subf %72, %73 : vector<8x1xf32>
    %75 = arith.mulf %74, %70 : vector<8x1xf32>
    %76 = arith.mulf %51, %55 : vector<8x1xf32>
    %77 = arith.mulf %76, %70 : vector<8x1xf32>
    %cst_23 = arith.constant 0.000000e+00 : f32
    %cst_24 = arith.constant 1.000000e+01 : f32
    %78 = arith.subf %cst_23, %cst_24 : f32
    %79 = vector.broadcast %78 : f32 to vector<8x1xf32>
    %80 = arith.mulf %79, %51 : vector<8x1xf32>
    %81 = arith.mulf %80, %70 : vector<8x1xf32>
    %cst_25 = arith.constant 1.000000e+01 : f32
    %82 = vector.broadcast %cst_25 : f32 to vector<8x1xf32>
    %83 = arith.mulf %82, %60 : vector<8x1xf32>
    %84 = arith.mulf %51, %51 : vector<8x1xf32>
    %85 = arith.subf %83, %84 : vector<8x1xf32>
    %86 = arith.mulf %85, %70 : vector<8x1xf32>
    %cst_26 = arith.constant 0.000000e+00 : f32
    %cst_27 = arith.constant 1.000000e+01 : f32
    %87 = arith.subf %cst_26, %cst_27 : f32
    %88 = vector.broadcast %87 : f32 to vector<8x1xf32>
    %89 = arith.mulf %88, %55 : vector<8x1xf32>
    %90 = arith.mulf %89, %70 : vector<8x1xf32>
    %cst_28 = arith.constant 1.000000e+01 : f32
    %cst_29 = arith.constant 1.000000e+01 : f32
    %91 = arith.mulf %cst_28, %cst_29 : f32
    %92 = vector.broadcast %91 : f32 to vector<8x1xf32>
    %93 = arith.mulf %92, %70 : vector<8x1xf32>
    %94 = vector.broadcast %11 : vector<8x1xf32> to vector<8x10xf32>
    %95 = arith.mulf %94, %5 : vector<8x10xf32>
    %96 = vector.broadcast %46 : vector<8x1xf32> to vector<8x10xf32>
    %97 = arith.mulf %95, %96 : vector<8x10xf32>
    %98 = vector.broadcast %13 : vector<8x1xf32> to vector<8x10xf32>
    %99 = arith.mulf %98, %9 : vector<8x10xf32>
    %100 = vector.broadcast %47 : vector<8x1xf32> to vector<8x10xf32>
    %101 = arith.mulf %99, %100 : vector<8x10xf32>
    %102 = arith.addf %97, %101 : vector<8x10xf32>
    %103 = vector.broadcast %12 : vector<8x1xf32> to vector<8x10xf32>
    %104 = arith.mulf %103, %7 : vector<8x10xf32>
    %105 = vector.broadcast %13 : vector<8x1xf32> to vector<8x10xf32>
    %106 = arith.mulf %105, %9 : vector<8x10xf32>
    %107 = vector.broadcast %46 : vector<8x1xf32> to vector<8x10xf32>
    %108 = arith.mulf %106, %107 : vector<8x10xf32>
    %109 = vector.broadcast %11 : vector<8x1xf32> to vector<8x10xf32>
    %110 = arith.mulf %109, %5 : vector<8x10xf32>
    %111 = vector.broadcast %47 : vector<8x1xf32> to vector<8x10xf32>
    %112 = arith.mulf %110, %111 : vector<8x10xf32>
    %113 = arith.subf %108, %112 : vector<8x10xf32>
    %114 = arith.mulf %35, %113 : vector<8x10xf32>
    %115 = arith.subf %102, %114 : vector<8x10xf32>
    %116 = arith.mulf %45, %113 : vector<8x10xf32>
    %117 = arith.subf %104, %116 : vector<8x10xf32>
    %cst_30 = arith.constant dense<0.000000e+00> : vector<8xf32>
    %118 = vector.multi_reduction <add>, %115, %cst_30 [1] : vector<8x10xf32> to vector<8xf32>
    %119 = vector.shape_cast %118 : vector<8xf32> to vector<8x1xf32>
    %cst_31 = arith.constant 0.000000e+00 : f32
    %120 = vector.broadcast %cst_31 : f32 to vector<8x1xf32>
    %121 = arith.subf %120, %119 : vector<8x1xf32>
    %cst_32 = arith.constant dense<0.000000e+00> : vector<8xf32>
    %122 = vector.multi_reduction <add>, %117, %cst_32 [1] : vector<8x10xf32> to vector<8xf32>
    %123 = vector.shape_cast %122 : vector<8xf32> to vector<8x1xf32>
    %cst_33 = arith.constant 0.000000e+00 : f32
    %124 = vector.broadcast %cst_33 : f32 to vector<8x1xf32>
    %125 = arith.subf %124, %123 : vector<8x1xf32>
    %126 = arith.mulf %35, %115 : vector<8x10xf32>
    %127 = arith.mulf %45, %117 : vector<8x10xf32>
    %128 = arith.addf %126, %127 : vector<8x10xf32>
    %cst_34 = arith.constant dense<0.000000e+00> : vector<8xf32>
    %129 = vector.multi_reduction <add>, %128, %cst_34 [1] : vector<8x10xf32> to vector<8xf32>
    %130 = vector.shape_cast %129 : vector<8xf32> to vector<8x1xf32>
    %131 = arith.mulf %75, %121 : vector<8x1xf32>
    %132 = arith.mulf %77, %125 : vector<8x1xf32>
    %133 = arith.addf %131, %132 : vector<8x1xf32>
    %134 = arith.mulf %81, %130 : vector<8x1xf32>
    %135 = arith.addf %133, %134 : vector<8x1xf32>
    %136 = arith.mulf %77, %121 : vector<8x1xf32>
    %137 = arith.mulf %86, %125 : vector<8x1xf32>
    %138 = arith.addf %136, %137 : vector<8x1xf32>
    %139 = arith.mulf %90, %130 : vector<8x1xf32>
    %140 = arith.addf %138, %139 : vector<8x1xf32>
    %141 = arith.mulf %81, %121 : vector<8x1xf32>
    %142 = arith.mulf %90, %125 : vector<8x1xf32>
    %143 = arith.addf %141, %142 : vector<8x1xf32>
    %144 = arith.mulf %93, %130 : vector<8x1xf32>
    %145 = arith.addf %143, %144 : vector<8x1xf32>
    %146 = vector.extract_strided_slice %22 {offsets = [0, 0], sizes = [8, 1], strides = [1, 1]} : vector<8x3xf32> to vector<8x1xf32>
    %147 = arith.subf %135, %146 : vector<8x1xf32>
    %148 = vector.extract_strided_slice %22 {offsets = [0, 1], sizes = [8, 1], strides = [1, 1]} : vector<8x3xf32> to vector<8x1xf32>
    %149 = arith.subf %140, %148 : vector<8x1xf32>
    %150 = vector.extract_strided_slice %22 {offsets = [0, 2], sizes = [8, 1], strides = [1, 1]} : vector<8x3xf32> to vector<8x1xf32>
    %151 = arith.subf %145, %150 : vector<8x1xf32>
    %152 = arith.mulf %147, %147 : vector<8x1xf32>
    %153 = arith.mulf %149, %149 : vector<8x1xf32>
    %154 = arith.addf %152, %153 : vector<8x1xf32>
    %155 = arith.mulf %151, %151 : vector<8x1xf32>
    %156 = arith.addf %154, %155 : vector<8x1xf32>
    %157 = math.sqrt %156 : vector<8x1xf32>
    %cst_35 = arith.constant 0.000000e+00 : f32
    %158 = vector.broadcast %cst_35 : f32 to vector<8x1xf32>
    %159 = arith.cmpf one, %157, %158 : vector<8x1xf32>
    %160 = arith.extui %159 : vector<8x1xi1> to vector<8x1xi32>
    %161 = arith.sitofp %160 : vector<8x1xi32> to vector<8x1xf32>
    %cst_36 = arith.constant dense<0.000000e+00> : vector<1xf32>
    %162 = vector.multi_reduction <add>, %161, %cst_36 [0] : vector<8x1xf32> to vector<1xf32>
    %163 = vector.shape_cast %162 : vector<1xf32> to vector<1x1xf32>
    %cst_37 = arith.constant dense<0.000000e+00> : vector<1xf32>
    %164 = vector.multi_reduction <add>, %157, %cst_37 [0] : vector<8x1xf32> to vector<1xf32>
    %165 = vector.shape_cast %164 : vector<1xf32> to vector<1x1xf32>
    %cst_38 = arith.constant 1.000000e+00 : f32
    %166 = vector.broadcast %cst_38 : f32 to vector<1x1xf32>
    %167 = arith.addf %163, %166 : vector<1x1xf32>
    %168 = arith.divf %165, %167 : vector<1x1xf32>
    %cst_39 = arith.constant 5.000000e-01 : f32
    %169 = vector.broadcast %cst_39 : f32 to vector<8x1xf32>
    %170 = arith.mulf %169, %11 : vector<8x1xf32>
    %171 = arith.mulf %170, %46 : vector<8x1xf32>
    %cst_40 = arith.constant 5.000000e-01 : f32
    %172 = vector.broadcast %cst_40 : f32 to vector<8x1xf32>
    %173 = arith.mulf %172, %11 : vector<8x1xf32>
    %174 = arith.mulf %173, %47 : vector<8x1xf32>
    %cst_41 = arith.constant 5.000000e-01 : f32
    %175 = vector.broadcast %cst_41 : f32 to vector<8x1xf32>
    %176 = arith.mulf %175, %12 : vector<8x1xf32>
    %cst_42 = arith.constant 5.000000e-01 : f32
    %177 = vector.broadcast %cst_42 : f32 to vector<8x1xf32>
    %178 = arith.mulf %177, %13 : vector<8x1xf32>
    %179 = arith.mulf %178, %47 : vector<8x1xf32>
    %cst_43 = arith.constant 5.000000e-01 : f32
    %180 = vector.broadcast %cst_43 : f32 to vector<8x1xf32>
    %181 = arith.mulf %180, %13 : vector<8x1xf32>
    %182 = arith.mulf %181, %46 : vector<8x1xf32>
    %cst_44 = arith.constant 0.000000e+00 : f32
    %183 = vector.broadcast %cst_44 : f32 to vector<8x1xf32>
    %184 = arith.subf %183, %174 : vector<8x1xf32>
    %cst_45 = arith.constant 0.000000e+00 : f32
    %185 = vector.broadcast %cst_45 : f32 to vector<8x1xf32>
    %186 = arith.subf %185, %171 : vector<8x1xf32>
    %cst_46 = arith.constant 0.000000e+00 : f32
    %187 = vector.broadcast %cst_46 : f32 to vector<8x1xf32>
    %188 = arith.subf %187, %176 : vector<8x1xf32>
    %cst_47 = arith.constant 0.000000e+00 : f32
    %189 = vector.broadcast %cst_47 : f32 to vector<8x1xf32>
    %190 = arith.subf %189, %179 : vector<8x1xf32>
    %cst_48 = arith.constant 0.000000e+00 : f32
    %191 = vector.broadcast %cst_48 : f32 to vector<8x1xf32>
    %192 = arith.subf %191, %182 : vector<8x1xf32>
    %cst_49 = arith.constant 0.000000e+00 : f32
    %193 = vector.broadcast %cst_49 : f32 to vector<8x1xf32>
    %cst_50 = arith.constant 1.000000e+01 : f32
    %194 = vector.broadcast %cst_50 : f32 to vector<8x1xf32>
    %195 = arith.mulf %194, %171 : vector<8x1xf32>
    %196 = arith.subf %121, %195 : vector<8x1xf32>
    %197 = arith.mulf %171, %51 : vector<8x1xf32>
    %198 = arith.subf %130, %197 : vector<8x1xf32>
    %199 = arith.mulf %184, %51 : vector<8x1xf32>
    %200 = arith.subf %196, %199 : vector<8x1xf32>
    %201 = arith.mulf %184, %55 : vector<8x1xf32>
    %202 = arith.subf %125, %201 : vector<8x1xf32>
    %203 = arith.mulf %184, %60 : vector<8x1xf32>
    %204 = arith.subf %198, %203 : vector<8x1xf32>
    %205 = arith.mulf %75, %200 : vector<8x1xf32>
    %206 = arith.mulf %77, %202 : vector<8x1xf32>
    %207 = arith.addf %205, %206 : vector<8x1xf32>
    %208 = arith.mulf %81, %204 : vector<8x1xf32>
    %209 = arith.addf %207, %208 : vector<8x1xf32>
    %210 = arith.mulf %77, %200 : vector<8x1xf32>
    %211 = arith.mulf %86, %202 : vector<8x1xf32>
    %212 = arith.addf %210, %211 : vector<8x1xf32>
    %213 = arith.mulf %90, %204 : vector<8x1xf32>
    %214 = arith.addf %212, %213 : vector<8x1xf32>
    %215 = arith.mulf %81, %200 : vector<8x1xf32>
    %216 = arith.mulf %90, %202 : vector<8x1xf32>
    %217 = arith.addf %215, %216 : vector<8x1xf32>
    %218 = arith.mulf %93, %204 : vector<8x1xf32>
    %219 = arith.addf %217, %218 : vector<8x1xf32>
    %220 = vector.extract_strided_slice %23 {offsets = [0, 0], sizes = [8, 1], strides = [1, 1]} : vector<8x18xf32> to vector<8x1xf32>
    %221 = arith.subf %209, %220 : vector<8x1xf32>
    %222 = vector.extract_strided_slice %23 {offsets = [0, 1], sizes = [8, 1], strides = [1, 1]} : vector<8x18xf32> to vector<8x1xf32>
    %223 = arith.subf %214, %222 : vector<8x1xf32>
    %224 = vector.extract_strided_slice %23 {offsets = [0, 2], sizes = [8, 1], strides = [1, 1]} : vector<8x18xf32> to vector<8x1xf32>
    %225 = arith.subf %219, %224 : vector<8x1xf32>
    %226 = arith.mulf %221, %221 : vector<8x1xf32>
    %227 = arith.mulf %223, %223 : vector<8x1xf32>
    %228 = arith.addf %226, %227 : vector<8x1xf32>
    %229 = arith.mulf %225, %225 : vector<8x1xf32>
    %230 = arith.addf %228, %229 : vector<8x1xf32>
    %231 = math.sqrt %230 : vector<8x1xf32>
    %232 = arith.addf %193, %231 : vector<8x1xf32>
    %cst_51 = arith.constant 1.000000e+01 : f32
    %233 = vector.broadcast %cst_51 : f32 to vector<8x1xf32>
    %234 = arith.mulf %233, %186 : vector<8x1xf32>
    %235 = arith.subf %121, %234 : vector<8x1xf32>
    %236 = arith.mulf %186, %51 : vector<8x1xf32>
    %237 = arith.subf %130, %236 : vector<8x1xf32>
    %238 = arith.mulf %174, %51 : vector<8x1xf32>
    %239 = arith.subf %235, %238 : vector<8x1xf32>
    %240 = arith.mulf %174, %55 : vector<8x1xf32>
    %241 = arith.subf %125, %240 : vector<8x1xf32>
    %242 = arith.mulf %174, %60 : vector<8x1xf32>
    %243 = arith.subf %237, %242 : vector<8x1xf32>
    %244 = arith.mulf %75, %239 : vector<8x1xf32>
    %245 = arith.mulf %77, %241 : vector<8x1xf32>
    %246 = arith.addf %244, %245 : vector<8x1xf32>
    %247 = arith.mulf %81, %243 : vector<8x1xf32>
    %248 = arith.addf %246, %247 : vector<8x1xf32>
    %249 = arith.mulf %77, %239 : vector<8x1xf32>
    %250 = arith.mulf %86, %241 : vector<8x1xf32>
    %251 = arith.addf %249, %250 : vector<8x1xf32>
    %252 = arith.mulf %90, %243 : vector<8x1xf32>
    %253 = arith.addf %251, %252 : vector<8x1xf32>
    %254 = arith.mulf %81, %239 : vector<8x1xf32>
    %255 = arith.mulf %90, %241 : vector<8x1xf32>
    %256 = arith.addf %254, %255 : vector<8x1xf32>
    %257 = arith.mulf %93, %243 : vector<8x1xf32>
    %258 = arith.addf %256, %257 : vector<8x1xf32>
    %259 = vector.extract_strided_slice %23 {offsets = [0, 3], sizes = [8, 1], strides = [1, 1]} : vector<8x18xf32> to vector<8x1xf32>
    %260 = arith.subf %248, %259 : vector<8x1xf32>
    %261 = vector.extract_strided_slice %23 {offsets = [0, 4], sizes = [8, 1], strides = [1, 1]} : vector<8x18xf32> to vector<8x1xf32>
    %262 = arith.subf %253, %261 : vector<8x1xf32>
    %263 = vector.extract_strided_slice %23 {offsets = [0, 5], sizes = [8, 1], strides = [1, 1]} : vector<8x18xf32> to vector<8x1xf32>
    %264 = arith.subf %258, %263 : vector<8x1xf32>
    %265 = arith.mulf %260, %260 : vector<8x1xf32>
    %266 = arith.mulf %262, %262 : vector<8x1xf32>
    %267 = arith.addf %265, %266 : vector<8x1xf32>
    %268 = arith.mulf %264, %264 : vector<8x1xf32>
    %269 = arith.addf %267, %268 : vector<8x1xf32>
    %270 = math.sqrt %269 : vector<8x1xf32>
    %271 = arith.addf %232, %270 : vector<8x1xf32>
    %cst_52 = arith.constant 1.000000e+01 : f32
    %272 = vector.broadcast %cst_52 : f32 to vector<8x1xf32>
    %273 = arith.mulf %272, %188 : vector<8x1xf32>
    %274 = arith.subf %125, %273 : vector<8x1xf32>
    %275 = arith.mulf %188, %55 : vector<8x1xf32>
    %276 = arith.subf %130, %275 : vector<8x1xf32>
    %277 = arith.mulf %75, %121 : vector<8x1xf32>
    %278 = arith.mulf %77, %274 : vector<8x1xf32>
    %279 = arith.addf %277, %278 : vector<8x1xf32>
    %280 = arith.mulf %81, %276 : vector<8x1xf32>
    %281 = arith.addf %279, %280 : vector<8x1xf32>
    %282 = arith.mulf %77, %121 : vector<8x1xf32>
    %283 = arith.mulf %86, %274 : vector<8x1xf32>
    %284 = arith.addf %282, %283 : vector<8x1xf32>
    %285 = arith.mulf %90, %276 : vector<8x1xf32>
    %286 = arith.addf %284, %285 : vector<8x1xf32>
    %287 = arith.mulf %81, %121 : vector<8x1xf32>
    %288 = arith.mulf %90, %274 : vector<8x1xf32>
    %289 = arith.addf %287, %288 : vector<8x1xf32>
    %290 = arith.mulf %93, %276 : vector<8x1xf32>
    %291 = arith.addf %289, %290 : vector<8x1xf32>
    %292 = vector.extract_strided_slice %23 {offsets = [0, 6], sizes = [8, 1], strides = [1, 1]} : vector<8x18xf32> to vector<8x1xf32>
    %293 = arith.subf %281, %292 : vector<8x1xf32>
    %294 = vector.extract_strided_slice %23 {offsets = [0, 7], sizes = [8, 1], strides = [1, 1]} : vector<8x18xf32> to vector<8x1xf32>
    %295 = arith.subf %286, %294 : vector<8x1xf32>
    %296 = vector.extract_strided_slice %23 {offsets = [0, 8], sizes = [8, 1], strides = [1, 1]} : vector<8x18xf32> to vector<8x1xf32>
    %297 = arith.subf %291, %296 : vector<8x1xf32>
    %298 = arith.mulf %293, %293 : vector<8x1xf32>
    %299 = arith.mulf %295, %295 : vector<8x1xf32>
    %300 = arith.addf %298, %299 : vector<8x1xf32>
    %301 = arith.mulf %297, %297 : vector<8x1xf32>
    %302 = arith.addf %300, %301 : vector<8x1xf32>
    %303 = math.sqrt %302 : vector<8x1xf32>
    %304 = arith.addf %271, %303 : vector<8x1xf32>
    %cst_53 = arith.constant 1.000000e+01 : f32
    %305 = vector.broadcast %cst_53 : f32 to vector<8x1xf32>
    %306 = arith.mulf %305, %176 : vector<8x1xf32>
    %307 = arith.subf %125, %306 : vector<8x1xf32>
    %308 = arith.mulf %176, %55 : vector<8x1xf32>
    %309 = arith.subf %130, %308 : vector<8x1xf32>
    %310 = arith.mulf %75, %121 : vector<8x1xf32>
    %311 = arith.mulf %77, %307 : vector<8x1xf32>
    %312 = arith.addf %310, %311 : vector<8x1xf32>
    %313 = arith.mulf %81, %309 : vector<8x1xf32>
    %314 = arith.addf %312, %313 : vector<8x1xf32>
    %315 = arith.mulf %77, %121 : vector<8x1xf32>
    %316 = arith.mulf %86, %307 : vector<8x1xf32>
    %317 = arith.addf %315, %316 : vector<8x1xf32>
    %318 = arith.mulf %90, %309 : vector<8x1xf32>
    %319 = arith.addf %317, %318 : vector<8x1xf32>
    %320 = arith.mulf %81, %121 : vector<8x1xf32>
    %321 = arith.mulf %90, %307 : vector<8x1xf32>
    %322 = arith.addf %320, %321 : vector<8x1xf32>
    %323 = arith.mulf %93, %309 : vector<8x1xf32>
    %324 = arith.addf %322, %323 : vector<8x1xf32>
    %325 = vector.extract_strided_slice %23 {offsets = [0, 9], sizes = [8, 1], strides = [1, 1]} : vector<8x18xf32> to vector<8x1xf32>
    %326 = arith.subf %314, %325 : vector<8x1xf32>
    %327 = vector.extract_strided_slice %23 {offsets = [0, 10], sizes = [8, 1], strides = [1, 1]} : vector<8x18xf32> to vector<8x1xf32>
    %328 = arith.subf %319, %327 : vector<8x1xf32>
    %329 = vector.extract_strided_slice %23 {offsets = [0, 11], sizes = [8, 1], strides = [1, 1]} : vector<8x18xf32> to vector<8x1xf32>
    %330 = arith.subf %324, %329 : vector<8x1xf32>
    %331 = arith.mulf %326, %326 : vector<8x1xf32>
    %332 = arith.mulf %328, %328 : vector<8x1xf32>
    %333 = arith.addf %331, %332 : vector<8x1xf32>
    %334 = arith.mulf %330, %330 : vector<8x1xf32>
    %335 = arith.addf %333, %334 : vector<8x1xf32>
    %336 = math.sqrt %335 : vector<8x1xf32>
    %337 = arith.addf %304, %336 : vector<8x1xf32>
    %cst_54 = arith.constant 1.000000e+01 : f32
    %338 = vector.broadcast %cst_54 : f32 to vector<8x1xf32>
    %339 = arith.mulf %338, %190 : vector<8x1xf32>
    %340 = arith.subf %121, %339 : vector<8x1xf32>
    %341 = arith.mulf %190, %51 : vector<8x1xf32>
    %342 = arith.subf %130, %341 : vector<8x1xf32>
    %343 = arith.mulf %192, %51 : vector<8x1xf32>
    %344 = arith.subf %340, %343 : vector<8x1xf32>
    %345 = arith.mulf %192, %55 : vector<8x1xf32>
    %346 = arith.subf %125, %345 : vector<8x1xf32>
    %347 = arith.mulf %192, %60 : vector<8x1xf32>
    %348 = arith.subf %342, %347 : vector<8x1xf32>
    %349 = arith.mulf %75, %344 : vector<8x1xf32>
    %350 = arith.mulf %77, %346 : vector<8x1xf32>
    %351 = arith.addf %349, %350 : vector<8x1xf32>
    %352 = arith.mulf %81, %348 : vector<8x1xf32>
    %353 = arith.addf %351, %352 : vector<8x1xf32>
    %354 = arith.mulf %77, %344 : vector<8x1xf32>
    %355 = arith.mulf %86, %346 : vector<8x1xf32>
    %356 = arith.addf %354, %355 : vector<8x1xf32>
    %357 = arith.mulf %90, %348 : vector<8x1xf32>
    %358 = arith.addf %356, %357 : vector<8x1xf32>
    %359 = arith.mulf %81, %344 : vector<8x1xf32>
    %360 = arith.mulf %90, %346 : vector<8x1xf32>
    %361 = arith.addf %359, %360 : vector<8x1xf32>
    %362 = arith.mulf %93, %348 : vector<8x1xf32>
    %363 = arith.addf %361, %362 : vector<8x1xf32>
    %364 = vector.extract_strided_slice %23 {offsets = [0, 12], sizes = [8, 1], strides = [1, 1]} : vector<8x18xf32> to vector<8x1xf32>
    %365 = arith.subf %353, %364 : vector<8x1xf32>
    %366 = vector.extract_strided_slice %23 {offsets = [0, 13], sizes = [8, 1], strides = [1, 1]} : vector<8x18xf32> to vector<8x1xf32>
    %367 = arith.subf %358, %366 : vector<8x1xf32>
    %368 = vector.extract_strided_slice %23 {offsets = [0, 14], sizes = [8, 1], strides = [1, 1]} : vector<8x18xf32> to vector<8x1xf32>
    %369 = arith.subf %363, %368 : vector<8x1xf32>
    %370 = arith.mulf %365, %365 : vector<8x1xf32>
    %371 = arith.mulf %367, %367 : vector<8x1xf32>
    %372 = arith.addf %370, %371 : vector<8x1xf32>
    %373 = arith.mulf %369, %369 : vector<8x1xf32>
    %374 = arith.addf %372, %373 : vector<8x1xf32>
    %375 = math.sqrt %374 : vector<8x1xf32>
    %376 = arith.addf %337, %375 : vector<8x1xf32>
    %cst_55 = arith.constant 1.000000e+01 : f32
    %377 = vector.broadcast %cst_55 : f32 to vector<8x1xf32>
    %378 = arith.mulf %377, %179 : vector<8x1xf32>
    %379 = arith.subf %121, %378 : vector<8x1xf32>
    %380 = arith.mulf %179, %51 : vector<8x1xf32>
    %381 = arith.subf %130, %380 : vector<8x1xf32>
    %382 = arith.mulf %182, %51 : vector<8x1xf32>
    %383 = arith.subf %379, %382 : vector<8x1xf32>
    %384 = arith.mulf %182, %55 : vector<8x1xf32>
    %385 = arith.subf %125, %384 : vector<8x1xf32>
    %386 = arith.mulf %182, %60 : vector<8x1xf32>
    %387 = arith.subf %381, %386 : vector<8x1xf32>
    %388 = arith.mulf %75, %383 : vector<8x1xf32>
    %389 = arith.mulf %77, %385 : vector<8x1xf32>
    %390 = arith.addf %388, %389 : vector<8x1xf32>
    %391 = arith.mulf %81, %387 : vector<8x1xf32>
    %392 = arith.addf %390, %391 : vector<8x1xf32>
    %393 = arith.mulf %77, %383 : vector<8x1xf32>
    %394 = arith.mulf %86, %385 : vector<8x1xf32>
    %395 = arith.addf %393, %394 : vector<8x1xf32>
    %396 = arith.mulf %90, %387 : vector<8x1xf32>
    %397 = arith.addf %395, %396 : vector<8x1xf32>
    %398 = arith.mulf %81, %383 : vector<8x1xf32>
    %399 = arith.mulf %90, %385 : vector<8x1xf32>
    %400 = arith.addf %398, %399 : vector<8x1xf32>
    %401 = arith.mulf %93, %387 : vector<8x1xf32>
    %402 = arith.addf %400, %401 : vector<8x1xf32>
    %403 = vector.extract_strided_slice %23 {offsets = [0, 15], sizes = [8, 1], strides = [1, 1]} : vector<8x18xf32> to vector<8x1xf32>
    %404 = arith.subf %392, %403 : vector<8x1xf32>
    %405 = vector.extract_strided_slice %23 {offsets = [0, 16], sizes = [8, 1], strides = [1, 1]} : vector<8x18xf32> to vector<8x1xf32>
    %406 = arith.subf %397, %405 : vector<8x1xf32>
    %407 = vector.extract_strided_slice %23 {offsets = [0, 17], sizes = [8, 1], strides = [1, 1]} : vector<8x18xf32> to vector<8x1xf32>
    %408 = arith.subf %402, %407 : vector<8x1xf32>
    %409 = arith.mulf %404, %404 : vector<8x1xf32>
    %410 = arith.mulf %406, %406 : vector<8x1xf32>
    %411 = arith.addf %409, %410 : vector<8x1xf32>
    %412 = arith.mulf %408, %408 : vector<8x1xf32>
    %413 = arith.addf %411, %412 : vector<8x1xf32>
    %414 = math.sqrt %413 : vector<8x1xf32>
    %415 = arith.addf %376, %414 : vector<8x1xf32>
    %cst_56 = arith.constant 0.000000e+00 : f32
    %416 = vector.broadcast %cst_56 : f32 to vector<8x1xf32>
    %417 = arith.cmpf one, %415, %416 : vector<8x1xf32>
    %418 = arith.extui %417 : vector<8x1xi1> to vector<8x1xi32>
    %419 = arith.sitofp %418 : vector<8x1xi32> to vector<8x1xf32>
    %cst_57 = arith.constant dense<0.000000e+00> : vector<1xf32>
    %420 = vector.multi_reduction <add>, %419, %cst_57 [0] : vector<8x1xf32> to vector<1xf32>
    %421 = vector.shape_cast %420 : vector<1xf32> to vector<1x1xf32>
    %cst_58 = arith.constant dense<0.000000e+00> : vector<1xf32>
    %422 = vector.multi_reduction <add>, %415, %cst_58 [0] : vector<8x1xf32> to vector<1xf32>
    %423 = vector.shape_cast %422 : vector<1xf32> to vector<1x1xf32>
    %cst_59 = arith.constant 1.000000e+00 : f32
    %424 = vector.broadcast %cst_59 : f32 to vector<1x1xf32>
    %425 = arith.addf %421, %424 : vector<1x1xf32>
    %426 = arith.divf %423, %425 : vector<1x1xf32>
    %427 = arith.addf %168, %426 : vector<1x1xf32>
    %428 = arith.cmpf one, %427, %427 : vector<1x1xf32>
    %cst_60 = arith.constant 0.000000e+00 : f32
    %429 = vector.broadcast %cst_60 : f32 to vector<1x1xf32>
    %430 = arith.select %428, %429, %427 : vector<1x1xi1>, vector<1x1xf32>
    %431 = math.absf %430 : vector<1x1xf32>
    %cst_61 = arith.constant 0x7F800000 : f32
    %432 = vector.broadcast %cst_61 : f32 to vector<1x1xf32>
    %433 = arith.cmpf oeq, %431, %432 : vector<1x1xf32>
    %cst_62 = arith.constant 1.000000e+00 : f32
    %434 = vector.broadcast %cst_62 : f32 to vector<1x1xf32>
    %435 = arith.select %433, %434, %430 : vector<1x1xi1>, vector<1x1xf32>
    %c0_63 = arith.constant 0 : index
    %c0_64 = arith.constant 0 : index
    %436 = vector.load %arg2[%c0_63, %c0_64] : memref<1x1xf32, #tpu.memory_space<vmem>>, vector<1x1xf32>
    tpu.vector_store %arg2[%c0_63, %c0_64], %435 {strides = array<i32>} : memref<1x1xf32, #tpu.memory_space<vmem>>, vector<1x1xf32>,
    return
  }
}

</mosaic_0001>

<bundles_post_ra>
// kernel: tpu_custom_call.1
= control target key start
LH: loop header
LB: loop body
LE: loop exit
PB: predicated region body
PF: predicated region fallthrough
CT: control target
= control target key end

     0   :  { %7 = vsyncpa [#allocation3], 0  ;;  %s1646_s0 = inlined_call_operand.hbm [shape: f32[5,8,10], index: 0, kind: input, shape index: {}]   ;;  %s1647_s1 = inlined_call_operand.hbm [shape: f32[8,32], index: 1, kind: input, shape index: {}]   ;;  %s1648_s2 = inlined_call_operand.hbm [shape: f32[1,1], index: 2, kind: output, shape index: {}]  }
   0x1   :  { %8 = vsyncpa [#allocation6], 0 }
   0x2   :  { %9 = vsyncpa [#allocation4], 0  ;;  %s14_s11 = sshll.u32 %s1646_s0, 4  ;;  %s1166_s12 = smov [#allocation2]   ;;  %s15_s11 = int_to_ptr.hbm [resolvable:$true] %s14_s11 }
   0x3   :  { %s16_s13 = sshll.u32 %s1166_s12, 4  ;;  %s28_s16 = sshll.u32 %s1647_s1, 4  ;;  %s17_s13 = int_to_ptr.vmem [resolvable:$true] %s16_s13  ;;  %s29_s16 = int_to_ptr.hbm [resolvable:$true] %s28_s16 }
   0x4   :  { %s1167_s17 = smov 128   ;;  %s1168_s18 = smov 8  }
   0x5   :  { %22 = dma.hbm_to_vmem [thread:$0]  %s15_s11, 640, %s17_s13, [#allocation3], %s1167_s17, %s1167_s17, %s1168_s18  }
   0x6   :  { %s1169_s19 = smov [#allocation5]  }
   0x7   :  { %s30_s20 = sshll.u32 %s1169_s19, 4  ;;  %s31_s20 = int_to_ptr.vmem [resolvable:$true] %s30_s20 }
   0x8   :  { %33 = dma.hbm_to_vmem [thread:$0]  %s29_s16, 128, %s31_s20, [#allocation6]  }
   0x9   :  { %1160 = dma.done.wait [#allocation3], 640  }
   0xa   :  { %1161 = vsyncadd [#allocation3], 4294966656 }
   0xb   :  { %1162 = dma.done.wait [#allocation6], 128  }
   0xc   :  { %1163 = vsyncadd [#allocation6], 4294967168  ;;  %v1170_v0 = vmov 6   ;;  %v1171_v1 = vmov 4   ;;  %v1172_v2 = vmov 9   ;;  %v1231_v3 = vld [vmem:[#allocation5] sm:$0xff] }
   0xd   :  { %1054 = vset.pattern.permute.xlu1 %v1170_v0  ;;  %1052 = vset.pattern.permute.xlu0 %v1171_v1  ;;  %1065 = vrcp.f32 %v1231_v3  ;;  %v110_v4 = vand.u32 2139095040, %v1231_v3  ;;  %v1239_v6 = vand.u32 2147483647, %v1231_v3  ;;  %v1173_v11 = vmov 7   ;;  %s1186_s0 = smov 109   ;;  %s1188_s1 = smov 106  }
   0xe   :  { %1056 = vset.pattern.permute.xlu2 %v1172_v2  ;;  %75 = vperm.xlu1 %1054, %v1231_v3   ;;  %v1174_v12 = vmov 5   ;;  %v1175_v16 = vmov 10   ;;  %v1176_v22 = vmov 683565275   ;;  %v1177_v24 = vmov 2475754826  }
   0xf   :  { %69 = vperm.xlu0 %1052, %v1231_v3   ;;  %80 = vperm.xlu2 %1056, %v1231_v3   ;;  %v111_v5 = vshrl.u32 %v110_v4, 23  ;;  %v114_v13 = vand.u32 8388607, %v1239_v6  ;;  %vm57_vm1 = vweird.f32 %v1231_v3  ;;  %v1178_v26 = vmov 2131351028   ;;  %s1189_s21 = smov 108  }
  0x10   :  { %v63_v28 = vand.u32 2147483648, %v1231_v3  ;;  %v1179_v32 = vmov 2102212464   ;;  %v1180_v36 = vmov 1   ;;  %v1181_v39 = vmov 2   ;;  %s1190_s22 = smov 104  }
  0x11   :  { %v1000_v7 = vadd.s32 4294967169, %v111_v5  ;;  %v115_v19 = vor.u32 8388608, %v114_v13  ;;  %v1182_v40 = vmov 920167782   ;;  %v1183_v45 = vmov 1326507024  }
  0x12   :  { %v1184_v47 = vmov 0   ;;  %v64_v49 = vor.u32 1.1754944e-38, %v63_v28  ;;  %vm62_vm8 = vcmp.eq.f32.partialorder %v1239_v6, 8.507059e+37  ;;  %v1185_v5 = vmov 8   ;;  %s1191_s23 = smov 107   ;;  %s1192_s24 = smov 102  }
  0x13   :  { %v1241_v8 = vpop.eup %1065  ;;  %v117_v10 = vadd.s32 1, %v1000_v7  ;;  %v1256_v34 = vshll.u32 %v115_v19, 8  ;;  %s1193_s25 = smov 105   ;;  %s1194_s26 = smov 103  }
  0x14   :  { %v53_v9 = vmul.f32 %v1241_v8, %v1231_v3  ;;  %vm58_vm2 = vweird.f32 %v1241_v8  ;;  %s1195_s27 = smov 127   ;;  %s1196_s28 = smov 100  }
  0x15   :  { %vm118_vm0 = vcmp.gt.s32.totalorder %v117_v10, 0  ;;  %vm1266_vm4 = vmor %vm57_vm1, %vm58_vm2  ;;  %v156_v55 = vand.u32 65535, %v1256_v34  ;;  %v157_v56 = vshrl.u32 %v1256_v34, 16  ;;  %vm108_vm2 = vcmp.le.f32.partialorder %v1239_v6, 0.7853982  ;;  %s1197_s29 = smov 125  }
  0x16   :  { %1055 = vset.pattern.permute.xlu1 %v1173_v11  ;;  %v54_v14 = vsub.f32 1.0, %v53_v9  ;;  %v119_v15 = vsel %vm118_vm0, %v117_v10, 0  ;;  %vm109_vm0 = vcmp.lt.s32.totalorder %v1231_v3, 0  ;;  %s1198_s30 = smov 114   ;;  %s1199_s3 = smov 110  }
  0x17   :  { %1053 = vset.pattern.permute.xlu0 %v1174_v12  ;;  %97 = vperm.xlu1 %1055, %v1231_v3   ;;  %v121_v17 = vand.u32 31, %v119_v15  ;;  %v1250_v20 = vshrl.u32 %v119_v15, 5  ;;  %s1200_s4 = smov 99   ;;  %s1201_s5 = smov 101  }
  0x18   :  { %91 = vperm.xlu0 %1053, %v1231_v3   ;;  %1057 = vset.pattern.permute.xlu2 %v1175_v16  ;;  %v55_v18 = vmul.f32 %v1241_v8, %v54_v14  ;;  %s1202_s6 = smov 111   ;;  %s1203_s7 = smov 113  }
  0x19   :  { %102 = vperm.xlu2 %1057, %v1231_v3   ;;  %v122_v21 = vsub.s32 32, %v121_v17  ;;  %v124_v23 = vshll.u32 %v1176_v22, %v121_v17  ;;  %v127_v25 = vshll.u32 %v1177_v24, %v121_v17  ;;  %v130_v27 = vshll.u32 %v1178_v26, %v121_v17  ;;  %s1204_s8 = smov 112   ;;  %s1205_s9 = smov 126  }
  0x1a   :  { %v56_v31 = vadd.f32 %v1241_v8, %v55_v18  ;;  %v133_v35 = vshll.u32 %v1179_v32, %v121_v17  ;;  %vm139_vm3 = vcmp.lt.s32.totalorder %v1250_v20, 1  ;;  %vm142_vm5 = vcmp.lt.s32.totalorder %v1250_v20, 4  ;;  %s1207_s10 = smov 11   ;;  %s1208_s11 = smov 117  }
  0x1b   :  { %v125_v29 = vshrl.u32 %v1177_v24, %v122_v21  ;;  %v128_v30 = vshrl.u32 %v1178_v26, %v122_v21  ;;  %v131_v33 = vshrl.u32 %v1179_v32, %v122_v21  ;;  %v134_v41 = vshrl.u32 %v1182_v40, %v122_v21  ;;  %s1209_s12 = smov [#allocation7]   ;;  %s989_s16 = sshll.u32 %s1648_s2, 4  ;;  %s990_s16 = int_to_ptr.hbm [resolvable:$true] %s989_s16 }
  0x1c   :  { %v136_v44 = vshll.u32 %v1182_v40, %v121_v17  ;;  %v137_v46 = vshrl.u32 %v1183_v45, %v122_v21  ;;  %vm141_vm6 = vcmp.lt.s32.totalorder %v1250_v20, 3  ;;  %vm140_vm7 = vcmp.lt.s32.totalorder %v1250_v20, 2  ;;  %s987_s13 = sshll.u32 %s1209_s12, 4  ;;  %s988_s13 = int_to_ptr.vmem [resolvable:$true] %s987_s13 }
  0x1d   :  { %v126_v37 = vor.u32 %v125_v29, %v124_v23  ;;  %v1258_v38 = vor.u32 %v128_v30, %v127_v25  ;;  %v132_v43 = vor.u32 %v131_v33, %v130_v27  ;;  %v135_v48 = vor.u32 %v134_v41, %v133_v35 }
  0x1e   :  { %v138_v50 = vor.u32 %v137_v46, %v136_v44  ;;  %v60_v52 = vsel %vm1266_vm4, %v1241_v8, %v56_v31  ;;  %v123_v1 = vshrl.u32 %v1176_v22, %v122_v21  ;;  %v1187_v26 = vmov 3  }
  0x1f   :  { %1060 = vset.pattern.permute.xlu1 %v1180_v36  ;;  %v147_v51 = vsel %vm139_vm3, %v126_v37, %v1258_v38  ;;  %v148_v53 = vsel %vm142_vm5, %v135_v48, 920167782  ;;  %v151_v54 = vsel %vm139_vm3, %v1258_v38, %v132_v43  ;;  %v65_v61 = vsel %vm62_vm8, %v64_v49, %v60_v52 }
  0x20   :  { %1059 = vset.pattern.permute.xlu0 %v1181_v39  ;;  %486 = vperm.xlu1 %1060, %v1231_v3   ;;  %v149_v57 = vsel %vm141_vm6, %v132_v43, %v148_v53  ;;  %v152_v58 = vsel %vm142_vm5, %v138_v50, 1326507024  ;;  %v144_v13 = vsel %vm142_vm5, %v132_v43, 2102212464  ;;  %v143_v21 = vsel %vm139_vm3, %v123_v1, %v126_v37 }
  0x21   :  { %474 = vperm.xlu0 %1059, %v1231_v3   ;;  %1058 = vset.pattern.permute.xlu2 %v1184_v47  ;;  %v150_v59 = vsel %vm140_vm7, %v147_v51, %v149_v57  ;;  %v153_v60 = vsel %vm141_vm6, %v135_v48, %v152_v58  ;;  %v145_v23 = vsel %vm141_vm6, %v1258_v38, %v144_v13 }
  0x22   :  { %463 = vperm.xlu2 %1058, %v1231_v3   ;;  %v154_v62 = vsel %vm140_vm7, %v151_v54, %v153_v60  ;;  %v180_v63 = vand.u32 65535, %v150_v59  ;;  %v181_v0 = vshrl.u32 %v150_v59, 16  ;;  %v146_v39 = vsel %vm140_vm7, %v143_v21, %v145_v23 }
  0x23   :  { %v158_v2 = vand.u32 65535, %v154_v62  ;;  %v159_v4 = vshrl.u32 %v154_v62, 16  ;;  %v200_v44 = vmul.u32 %v1256_v34, %v146_v39 }
  0x24   :  { %v182_v7 = vmul.u32 %v180_v63, %v156_v55  ;;  %v183_v8 = vmul.u32 %v181_v0, %v156_v55  ;;  %v184_v9 = vmul.u32 %v180_v63, %v157_v56  ;;  %v185_v14 = vmul.u32 %v181_v0, %v157_v56 }
  0x25   :  { %v160_v10 = vmul.u32 %v158_v2, %v156_v55  ;;  %v161_v11 = vmul.u32 %v159_v4, %v156_v55  ;;  %v162_v12 = vmul.u32 %v158_v2, %v157_v56  ;;  %v163_v17 = vmul.u32 %v159_v4, %v157_v56 }
  0x26   :  { %v186_v15 = vshll.u32 %v183_v8, 16  ;;  %v188_v16 = vshll.u32 %v184_v9, 16  ;;  %v187_v28 = vshrl.u32 %v183_v8, 16  ;;  %v189_v35 = vshrl.u32 %v184_v9, 16 }
  0x27   :  { %v164_v18 = vshll.u32 %v161_v11, 16  ;;  %v166_v19 = vshll.u32 %v162_v12, 16  ;;  %v165_v30 = vshrl.u32 %v161_v11, 16  ;;  %v167_v37 = vshrl.u32 %v162_v12, 16 }
  0x28   :  { %1061 = vset.pattern.permute.xlu1 %v1185_v5  ;;  %vm190_vm9 = vc.u32 %v182_v7, %v186_v15  ;;  %v192_v22 = vadd.s32 %v186_v15, %v182_v7 }
  0x29   :  { %698 = vrot.lane.b32.xlu0 %v1231_v3, %s1186_s0  ;;  %86 = vperm.xlu1 %1061, %v65_v61   ;;  %vm168_vm10 = vc.u32 %v160_v10, %v164_v18  ;;  %v170_v24 = vadd.s32 %v164_v18, %v160_v10  ;;  %v191_v25 = vsel %vm190_vm9, 1, %v1184_v47 }
  0x2a   :  { %1064 = vset.pattern.permute.xlu0 %v1180_v36  ;;  %1063 = vset.pattern.permute.xlu2 %v1187_v26  ;;  %v169_v27 = vsel %vm168_vm10, 1, %v1184_v47  ;;  %v193_v29 = vadd.s32 %v191_v25, %v185_v14  ;;  %vm194_vm11 = vc.u32 %v192_v22, %v188_v16  ;;  %v196_v42 = vadd.s32 %v192_v22, %v188_v16 }
  0x2b   :  { %v171_v31 = vadd.s32 %v169_v27, %v163_v17  ;;  %vm172_vm12 = vc.u32 %v170_v24, %v166_v19  ;;  %v195_v32 = vsel %vm194_vm11, 1, %v1184_v47 }
  0x2c   :  { %v173_v33 = vsel %vm172_vm12, 1, %v1184_v47  ;;  %v197_v36 = vadd.s32 %v195_v32, %v193_v29 }
  0x2d   :  { %v175_v38 = vadd.s32 %v173_v33, %v171_v31 }
  0x2e   :  { %v198_v40 = vadd.s32 %v197_v36, %v187_v28 }
  0x2f   :  { %v176_v41 = vadd.s32 %v175_v38, %v165_v30 }
  0x30   :  { %v199_v43 = vadd.s32 %v198_v40, %v189_v35 }
  0x31   :  { %783 = vrot.lane.b32.xlu0 %v1231_v3, %s1188_s1  ;;  %737 = vrot.lane.b32.xlu1 %v1231_v3, %s1189_s21  ;;  %v177_v45 = vadd.s32 %v176_v41, %v167_v37 }
  0x32   :  { %1062 = vset.pattern.permute.xlu1 %v1187_v26  ;;  %v203_v46 = vadd.s32 1, %v199_v43 }
  0x33   :  { %vm202_vm13 = vc.u32 %v177_v45, %v196_v42  ;;  %v201_v55 = vadd.s32 %v196_v42, %v177_v45  ;;  %v44_v45 = vld [vmem:[#allocation2 + $0x8] sm:$0xff] }
  0x34   :  { %v204_v47 = vsel %vm202_vm13, %v203_v46, %v199_v43  ;;  %v42_v43 = vld [vmem:[#allocation2] sm:$0xff] }
  0x35   :  { %v205_v48 = vadd.s32 %v204_v47, %v200_v44 }
  0x37   :  { %v206_v20 = vadd.s32 536870912, %v205_v48 }
  0x39   :  { %791 = vrot.lane.b32.xlu0 %v1231_v3, %s1190_s22  ;;  %741 = vrot.lane.b32.xlu1 %v1231_v3, %s1191_s23  ;;  %v207_v49 = vshrl.u32 %v206_v20, 30 }
  0x3b   :  { %v208_v50 = vshll.u32 %v207_v49, 30  ;;  %v231_v5 = vsub.s32 4, %v207_v49 }
  0x3d   :  { %v209_v34 = vsub.s32 %v205_v48, %v208_v50  ;;  %v232_v9 = vsel %vm109_vm0, %v231_v5, %v207_v49 }
  0x3e   :  { %v234_v12 = vsel %vm108_vm2, 0, %v232_v9  ;;  %v50_v9 = vld [vmem:[#allocation2 + $0x20] sm:$0xff] }
  0x3f   :  { %vm210_vm14 = vcmp.lt.s32.totalorder %v209_v34, 0  ;;  %v211_v51 = vsub.s32 0, %v209_v34  ;;  %v405_v17 = vadd.s32 3, %v234_v12  ;;  %v251_v23 = vand.u32 3, %v234_v12 }
  0x41   :  { %847 = vrot.lane.b32.xlu0 %v1231_v3, %s1192_s24  ;;  %787 = vrot.lane.b32.xlu1 %v1231_v3, %s1193_s25  ;;  %v212_v52 = vsel %vm210_vm14, %v211_v51, %v209_v34  ;;  %v406_v24 = vand.u32 3, %v405_v17  ;;  %vm256_vm3 = vcmp.eq.s32.totalorder %v251_v23, 2  ;;  %vm252_vm5 = vcmp.lt.s32.totalorder %v251_v23, 2 }
  0x42   :  { %v213_v53 = vclz %v212_v52  ;;  %vm253_vm6 = vcmp.eq.s32.totalorder %v251_v23, 0 }
  0x43   :  { %vm411_vm4 = vcmp.eq.s32.totalorder %v406_v24, 2  ;;  %vm408_vm7 = vcmp.eq.s32.totalorder %v406_v24, 0  ;;  %vm407_vm8 = vcmp.lt.s32.totalorder %v406_v24, 2 }
  0x44   :  { %v1001_v54 = vadd.s32 4294967294, %v213_v53 }
  0x46   :  { %vm1002_vm15 = vcmp.lt.s32.totalorder %v1001_v54, 0 }
  0x47   :  { %v216_v56 = vsel %vm1002_vm15, 0, %v1001_v54 }
  0x48   :  { %v217_v57 = vsub.s32 32, %v216_v56  ;;  %v218_v58 = vshll.u32 %v209_v34, %v216_v56  ;;  %v221_v59 = vsub.s32 4294967266, %v216_v56 }
  0x49   :  { %843 = vrot.lane.b32.xlu1 %v1231_v3, %s1194_s26 }
  0x4a   :  { %v219_v60 = vshrl.u32 %v201_v55, %v217_v57  ;;  %v222_v61 = vadd.s32 127, %v221_v59 }
  0x4c   :  { %v220_v62 = vor.u32 %v219_v60, %v218_v58  ;;  %v223_v63 = vshll.u32 %v222_v61, 23 }
  0x4e   :  { %v224_v0 = vor.u32 4788187, %v223_v63  ;;  %v227_v1 = vcvt.s32.f32 %v220_v62 }
  0x50   :  { %v225_v2 = vand.u32 2147483647, %v224_v0 }
  0x52   :  { %v228_v4 = vmul.f32 %v227_v1, %v225_v2 }
  0x54   :  { %v229_v7 = vxor.u32 2147483648, %v228_v4 }
  0x56   :  { %v230_v8 = vsel %vm109_vm0, %v229_v7, %v228_v4  ;;  %v46_v7 = vld [vmem:[#allocation2 + $0x10] sm:$0xff] }
  0x57   :  { %v233_v10 = vsel %vm108_vm2, %v1231_v3, %v230_v8 }
  0x58   :  { %v235_v11 = vmul.f32 %v233_v10, %v233_v10 }
  0x5a   :  { %v236_v13 = vmul.f32 -0.001358992, %v235_v11  ;;  %v243_v14 = vmul.f32 -0.00019511016, %v235_v11 }
  0x5c   :  { %v237_v15 = vadd.f32 0.041655596, %v236_v13  ;;  %v244_v16 = vadd.f32 0.008332121, %v243_v14 }
  0x5e   :  { %v238_v18 = vmul.f32 %v237_v15, %v235_v11  ;;  %v245_v19 = vmul.f32 %v244_v16, %v235_v11 }
  0x60   :  { %v239_v21 = vadd.f32 -0.4999988, %v238_v18  ;;  %v246_v22 = vadd.f32 -0.16666654, %v245_v19  ;;  %v48_v18 = vld [vmem:[#allocation2 + $0x18] sm:$0xff] }
  0x62   :  { %v240_v25 = vmul.f32 %v239_v21, %v235_v11  ;;  %v247_v6 = vmul.f32 %v246_v22, %v235_v11 }
  0x64   :  { %v241_v26 = vadd.f32 1.0, %v240_v25  ;;  %v248_v27 = vadd.f32 1.0, %v247_v6 }
  0x66   :  { %v249_v28 = vmul.f32 %v248_v27, %v233_v10  ;;  %v257_v29 = vxor.u32 2147483648, %v241_v26 }
  0x68   :  { %v254_v30 = vxor.u32 2147483648, %v249_v28  ;;  %v258_v31 = vsel %vm256_vm3, %v257_v29, %v249_v28  ;;  %v413_v32 = vsel %vm411_vm4, %v257_v29, %v249_v28 }
  0x69   :  { %v81_v46 = vpop.permute.xlu2 %80 }
  0x6a   :  { %v255_v33 = vsel %vm253_vm6, %v241_v26, %v254_v30  ;;  %v410_v35 = vsel %vm408_vm7, %v241_v26, %v254_v30 }
  0x6b   :  { %v259_v36 = vsel %vm252_vm5, %v255_v33, %v258_v31  ;;  %v414_v37 = vsel %vm407_vm8, %v410_v35, %v413_v32 }
  0x6c   :  { %v260_v38 = vsel %vm57_vm1, nan, %v259_v36  ;;  %v1329_v39 = vsel %vm57_vm1, nan, %v414_v37  ;;  %vm416_vm1 = vcmask 80896  }
  0x6d   :  { %469 = vperm.xlu1 %1062, %v260_v38   ;;  %480 = vperm.xlu2 %1063, %v1329_v39  }
  0x73   :  { %v103_v52 = vpop.permute.xlu2 %102 }
  0x75   :  { %597 = vrot.lane.b32.xlu2 %v1329_v39, %s1195_s27  ;;  %601 = vrot.lane.b32.xlu1 %v260_v38, %s1195_s27 }
  0x7c   :  { %v464_v4 = vpop.permute.xlu2 %463 }
  0x7d   :  { %v466_v10 = vmul.f32 %v464_v4, %v46_v7 }
  0x80   :  { %v76_v40 = vpop.permute.xlu1 %75 }
  0x81   :  { %v70_v41 = vpop.permute.xlu0 %69 }
  0x82   :  { %v72_v47 = vadd.f32 %v70_v41, %v42_v43 }
  0x84   :  { %v73_v20 = vmul.f32 4.0, %v72_v47 }
  0x86   :  { %v78_v34 = vsub.f32 %v73_v20, %v76_v40 }
  0x88   :  { %v83_v53 = vsub.f32 %v78_v34, %v81_v46  ;;  %v1380_v34 = vmul.f32 0.5, %v1231_v3 }
  0x89   :  { %v98_v42 = vpop.permute.xlu1 %97 }
  0x8a   :  { %v92_v44 = vpop.permute.xlu0 %91 }
  0x8b   :  { %v94_v48 = vadd.f32 %v92_v44, %v44_v45 }
  0x8d   :  { %v95_v49 = vmul.f32 4.0, %v94_v48 }
  0x8f   :  { %v100_v51 = vsub.f32 %v95_v49, %v98_v42 }
  0x91   :  { %v105_v54 = vsub.f32 %v100_v51, %v103_v52 }
  0x92   :  { %v487_v50 = vpop.permute.xlu1 %486 }
  0x93   :  { %v475_v8 = vpop.permute.xlu0 %474  ;;  %v489_v21 = vmul.f32 %v487_v50, %v48_v18 }
  0x94   :  { %v477_v11 = vmul.f32 %v475_v8, %v50_v9 }
  0x9b   :  { %v87_v55 = vpop.permute.xlu1 %86  ;;  %v1355_v32 = vpop.permute.xlu0 %698 }
  0x9c   :  { %v89_v56 = vmul.f32 %v87_v55, %v83_v53  ;;  %v106_v57 = vmul.f32 %v105_v54, %v87_v55 }
  0x9e   :  { %v417_v58 = vsel %vm416_vm1, %v89_v56, 0.0  ;;  %v425_v59 = vmul.f32 %v89_v56, %v89_v56  ;;  %v426_v60 = vmul.f32 %v106_v57, %v106_v57  ;;  %v421_v61 = vsel %vm416_vm1, %v106_v57, 0.0 }
  0x9f   :  { %418 = vadd.xlane.f32.xlu0 %v417_v58  ;;  %422 = vadd.xlane.f32.xlu2 %v421_v61 }
  0xa0   :  { %v427_v62 = vadd.f32 %v426_v60, %v425_v59 }
  0xa2   :  { %v428_v63 = vsel %vm416_vm1, %v427_v62, 0.0  ;;  %v607_v62 = vsub.f32 0.0, %v1380_v34 }
  0xa3   :  { %429 = vadd.xlane.f32.xlu1 %v428_v63  ;;  %v1338_v0 = vpop.permute.xlu1 %737  ;;  %v1360_v33 = vpop.permute.xlu0 %783 }
  0xab   :  { %v1342_v1 = vpop.permute.xlu1 %741  ;;  %v1363_v35 = vpop.permute.xlu0 %791 }
  0xb3   :  { %v1345_v2 = vpop.permute.xlu1 %787 }
  0xbb   :  { %v1348_v5 = vpop.permute.xlu1 %843 }
  0xbc   :  { %902 = vrot.lane.b32.xlu1 %v1231_v3, %s1196_s28 }
  0xc4   :  { %589 = vrot.lane.b32.xlu1 %v260_v38, %s1197_s29  ;;  %v1366_v38 = vpop.permute.xlu0 %847 }
  0xc7   :  { %v481_v12 = vpop.permute.xlu2 %480 }
  0xc8   :  { %v491_v14 = vmul.f32 %v481_v12, %v466_v10  ;;  %v483_v15 = vmul.f32 %v481_v12, %v477_v11 }
  0xcc   :  { %635 = vrot.lane.b32.xlu1 %v1231_v3, %s1198_s30 }
  0xcf   :  { %v598_v36 = vpop.permute.xlu2 %597 }
  0xd0   :  { %v600_v53 = vmul.f32 %v598_v36, %v1380_v34 }
  0xd2   :  { %v1386_v61 = vmul.f32 10.0, %v600_v53 }
  0xd4   :  { %694 = vrot.lane.b32.xlu1 %v1231_v3, %s1199_s3 }
  0xdf   :  { %v470_v13 = vpop.permute.xlu1 %469 }
  0xe0   :  { %v472_v16 = vmul.f32 %v470_v13, %v466_v10  ;;  %v490_v17 = vmul.f32 %v477_v11, %v470_v13  ;;  %v720_v11 = vmul.f32 10.0, %v607_v62 }
  0xe2   :  { %v492_v19 = vsub.f32 %v490_v17, %v491_v14  ;;  %v484_v22 = vadd.f32 %v483_v15, %v472_v16  ;;  %v767_v16 = vmul.f32 10.0, %v1380_v34 }
  0xe4   :  { %v493_v23 = vmul.f32 %v492_v19, %v89_v56  ;;  %v495_v24 = vmul.f32 %v492_v19, %v106_v57 }
  0xe6   :  { %v494_v25 = vsub.f32 %v484_v22, %v493_v23  ;;  %v496_v6 = vsub.f32 %v489_v21, %v495_v24 }
  0xe7   :  { %v602_v37 = vpop.permute.xlu1 %601 }
  0xe8   :  { %v501_v26 = vsel %vm416_vm1, %v496_v6, 0.0  ;;  %v505_v27 = vmul.f32 %v494_v25, %v89_v56  ;;  %v506_v28 = vmul.f32 %v496_v6, %v106_v57  ;;  %v497_v31 = vsel %vm416_vm1, %v494_v25, 0.0 }
  0xe9   :  { %502 = vadd.xlane.f32.xlu0 %v501_v26  ;;  %v604_v55 = vmul.f32 %v602_v37, %v1380_v34  ;;  %v608_v56 = vsub.f32 0.0, %v600_v53 }
  0xea   :  { %v507_v29 = vadd.f32 %v506_v28, %v505_v27 }
  0xeb   :  { %v609_v58 = vsub.f32 0.0, %v604_v55  ;;  %v1393_v63 = vmul.f32 10.0, %v608_v56 }
  0xec   :  { %v508_v30 = vsel %vm416_vm1, %v507_v29, 0.0 }
  0xed   :  { %509 = vadd.xlane.f32.xlu2 %v508_v30 }
  0xf1   :  { %498 = vadd.xlane.f32.xlu0 %v497_v31 }
 0x105   :  { %906 = vrot.lane.b32.xlu0 %v1231_v3, %s1200_s4  ;;  %898 = vrot.lane.b32.xlu2 %v1231_v3, %s1201_s5 }
 0x10d   :  { %593 = vrot.lane.b32.xlu0 %v1329_v39, %s1197_s29  ;;  %690 = vrot.lane.b32.xlu2 %v1231_v3, %s1202_s6 }
 0x112   :  { %v423_v40 = vpop.xlane.xlu2 %422  ;;  %v419_v42 = vpop.xlane.xlu0 %418 }
 0x113   :  { %v1368_v41 = vsub.f32 0.0, %v423_v40  ;;  %v1375_v45 = vsub.f32 0.0, %v419_v42 }
 0x115   :  { %639 = vrot.lane.b32.xlu0 %v1231_v3, %s1203_s7  ;;  %v432_v43 = vmul.f32 %v1368_v41, %v1368_v41  ;;  %v434_v47 = vmul.f32 %v1375_v45, %v1375_v45  ;;  %v455_v4 = vmul.f32 -10.0, %v1375_v45  ;;  %v819_v8 = vmul.f32 %v608_v56, %v1375_v45 }
 0x116   :  { %v1370_v39 = vpop.xlane.xlu1 %429  ;;  %v1400_v12 = vmul.f32 %v609_v58, %v1375_v45  ;;  %v875_v13 = vmul.f32 %v600_v53, %v1375_v45  ;;  %v877_v17 = vmul.f32 %v604_v55, %v1375_v45  ;;  %v453_v18 = vmul.f32 %v1368_v41, %v1375_v45 }
 0x117   :  { %v431_v44 = vmul.f32 10.0, %v1370_v39  ;;  %v825_v14 = vmul.f32 %v609_v58, %v1370_v39  ;;  %v881_v21 = vmul.f32 %v604_v55, %v1370_v39  ;;  %v459_v23 = vmul.f32 -10.0, %v1368_v41 }
 0x118   :  { %v823_v24 = vmul.f32 %v609_v58, %v1368_v41  ;;  %v722_v26 = vmul.f32 %v607_v62, %v1368_v41  ;;  %v769_v27 = vmul.f32 %v1380_v34, %v1368_v41  ;;  %v879_v29 = vmul.f32 %v604_v55, %v1368_v41 }
 0x119   :  { %v433_v46 = vsub.f32 %v431_v44, %v432_v43  ;;  %v457_v25 = vsub.f32 %v431_v44, %v434_v47 }
 0x11b   :  { %v435_v48 = vsub.f32 %v433_v46, %v434_v47 }
 0x11d   :  { %643 = vrot.lane.b32.xlu0 %v1231_v3, %s1204_s8  ;;  %v436_v20 = vmul.f32 10.0, %v435_v48 }
 0x11f   :  { %1067 = vrcp.f32 %v436_v20  ;;  %v448_v59 = vand.u32 2147483648, %v436_v20  ;;  %vm442_vm10 = vweird.f32 %v436_v20  ;;  %v446_v60 = vand.u32 2147483647, %v436_v20 }
 0x121   :  { %v449_v9 = vor.u32 1.1754944e-38, %v448_v59  ;;  %vm447_vm12 = vcmp.eq.f32.partialorder %v446_v60, 8.507059e+37 }
 0x125   :  { %v1068_v49 = vpop.eup %1067 }
 0x126   :  { %v438_v50 = vmul.f32 %v1068_v49, %v436_v20  ;;  %vm443_vm9 = vweird.f32 %v1068_v49 }
 0x127   :  { %vm1388_vm11 = vmor %vm442_vm10, %vm443_vm9  ;;  %vm935_vm10 = vcmask 7168  }
 0x128   :  { %v439_v51 = vsub.f32 1.0, %v438_v50 }
 0x12a   :  { %v440_v54 = vmul.f32 %v1068_v49, %v439_v51 }
 0x12c   :  { %v441_v57 = vadd.f32 %v1068_v49, %v440_v54 }
 0x12e   :  { %v1382_v52 = vpop.permute.xlu1 %902  ;;  %v445_v7 = vsel %vm1388_vm11, %v1068_v49, %v441_v57 }
 0x12f   :  { %v450_v19 = vsel %vm447_vm12, %v449_v9, %v445_v7 }
 0x130   :  { %v1421_v30 = vmul.f32 %v450_v19, %v433_v46  ;;  %v1423_v31 = vmul.f32 %v453_v18, %v450_v19  ;;  %v1425_v36 = vmul.f32 %v455_v4, %v450_v19  ;;  %v1430_v42 = vmul.f32 %v457_v25, %v450_v19 }
 0x131   :  { %v1432_v43 = vmul.f32 %v459_v23, %v450_v19  ;;  %v1436_v48 = vmul.f32 100.0, %v450_v19 }
 0x132   :  { %1656 = vst [vmem:[#allocation11_spill] sm:$0xff] %v1421_v30 }
 0x136   :  { %v590_v10 = vpop.permute.xlu1 %589 }
 0x137   :  { %v1414_v6 = vmul.f32 %v590_v10, %v1380_v34 }
 0x15c   :  { %v503_v15 = vpop.xlane.xlu0 %502 }
 0x15d   :  { %v1409_v22 = vsub.f32 0.0, %v503_v15 }
 0x15f   :  { %v721_v28 = vsub.f32 %v1409_v22, %v720_v11  ;;  %v768_v40 = vsub.f32 %v1409_v22, %v767_v16  ;;  %v824_v49 = vsub.f32 %v1409_v22, %v823_v24  ;;  %v880_v54 = vsub.f32 %v1409_v22, %v879_v29 }
 0x160   :  { %v1427_v37 = vpop.xlane.xlu2 %509 }
 0x161   :  { %v723_v44 = vsub.f32 %v1427_v37, %v722_v26  ;;  %v770_v47 = vsub.f32 %v1427_v37, %v769_v27  ;;  %v820_v20 = vsub.f32 %v1427_v37, %v819_v8  ;;  %v724_v50 = vmul.f32 %v721_v28, %v1423_v31 }
 0x162   :  { %v728_v51 = vmul.f32 %v721_v28, %v1430_v42  ;;  %v732_v53 = vmul.f32 %v721_v28, %v1432_v43  ;;  %v771_v57 = vmul.f32 %v768_v40, %v1423_v31  ;;  %v775_v58 = vmul.f32 %v768_v40, %v1430_v42 }
 0x163   :  { %v726_v55 = vmul.f32 %v723_v44, %v1425_v36  ;;  %v730_v56 = vmul.f32 %v723_v44, %v1432_v43  ;;  %v734_v60 = vmul.f32 %v723_v44, %v1436_v48  ;;  %v773_v3 = vmul.f32 %v770_v47, %v1425_v36 }
 0x164   :  { %v499_v59 = vpop.xlane.xlu0 %498  ;;  %v777_v62 = vmul.f32 %v770_v47, %v1432_v43  ;;  %v781_v7 = vmul.f32 %v770_v47, %v1436_v48  ;;  %v826_v8 = vsub.f32 %v820_v20, %v825_v14  ;;  %v779_v9 = vmul.f32 %v768_v40, %v1432_v43 }
 0x165   :  { %v1452_v4 = vsub.f32 0.0, %v499_v59  ;;  %v876_v10 = vsub.f32 %v1427_v37, %v875_v13  ;;  %v828_v14 = vmul.f32 %v824_v49, %v1423_v31  ;;  %v833_v19 = vmul.f32 %v824_v49, %v1430_v42 }
 0x166   :  { %v838_v13 = vmul.f32 %v824_v49, %v1432_v43  ;;  %v830_v44 = vmul.f32 %v826_v8, %v1425_v36  ;;  %v889_v20 = vmul.f32 %v880_v54, %v1430_v42 }
 0x167   :  { %v1459_v11 = vmul.f32 %v1452_v4, %v1421_v30  ;;  %v1463_v15 = vmul.f32 %v1452_v4, %v1423_v31  ;;  %v1467_v16 = vmul.f32 %v1452_v4, %v1425_v36  ;;  %v818_v18 = vsub.f32 %v1452_v4, %v1393_v63 }
 0x168   :  { %v874_v23 = vsub.f32 %v1452_v4, %v1386_v61  ;;  %v882_v27 = vsub.f32 %v876_v10, %v881_v21  ;;  %v884_v61 = vmul.f32 %v880_v54, %v1423_v31 }
 0x169   :  { %1657 = vst [vmem:[#allocation12_spill] sm:$0xff] %v1467_v16  ;;  %v725_v24 = vadd.f32 %v724_v50, %v1459_v11  ;;  %v729_v25 = vadd.f32 %v728_v51, %v1463_v15  ;;  %v772_v26 = vadd.f32 %v771_v57, %v1459_v11  ;;  %v776_v28 = vadd.f32 %v775_v58, %v1463_v15 }
 0x16a   :  { %v780_v63 = vadd.f32 %v779_v9, %v1467_v16  ;;  %v822_v29 = vsub.f32 %v818_v18, %v1400_v12  ;;  %v878_v40 = vsub.f32 %v874_v23, %v877_v17  ;;  %v733_v47 = vadd.f32 %v732_v53, %v1467_v16 }
 0x16b   :  { %v727_v49 = vadd.f32 %v726_v55, %v725_v24  ;;  %v731_v50 = vadd.f32 %v730_v56, %v729_v25  ;;  %v774_v57 = vadd.f32 %v773_v3, %v772_v26  ;;  %v778_v59 = vadd.f32 %v777_v62, %v776_v28 }
 0x16c   :  { %v827_v51 = vmul.f32 %v822_v29, %v1421_v30  ;;  %v832_v21 = vmul.f32 %v822_v29, %v1423_v31  ;;  %v837_v58 = vmul.f32 %v822_v29, %v1425_v36  ;;  %v883_v12 = vmul.f32 %v878_v40, %v1421_v30  ;;  %v899_v29 = vpop.permute.xlu2 %898 }
 0x16d   :  { %v888_v17 = vmul.f32 %v878_v40, %v1423_v31  ;;  %v782_v9 = vadd.f32 %v781_v7, %v780_v63  ;;  %v886_v53 = vmul.f32 %v882_v27, %v1425_v36  ;;  %v893_v10 = vmul.f32 %v878_v40, %v1425_v36 }
 0x16e   :  { %v885_v18 = vadd.f32 %v884_v61, %v883_v12  ;;  %v891_v56 = vmul.f32 %v882_v27, %v1432_v43  ;;  %v894_v23 = vmul.f32 %v880_v54, %v1432_v43  ;;  %v735_v24 = vadd.f32 %v734_v60, %v733_v47 }
 0x16f   :  { %v890_v55 = vadd.f32 %v889_v20, %v888_v17  ;;  %v829_v3 = vadd.f32 %v828_v14, %v827_v51  ;;  %v834_v25 = vadd.f32 %v833_v19, %v832_v21  ;;  %v839_v26 = vadd.f32 %v838_v13, %v837_v58 }
 0x170   :  { %v887_v46 = vadd.f32 %v886_v53, %v885_v18  ;;  %v895_v30 = vadd.f32 %v894_v23, %v893_v10  ;;  %v786_v62 = vsub.f32 %v774_v57, %v1360_v33  ;;  %v790_v7 = vsub.f32 %v778_v59, %v1345_v2 }
 0x171   :  { %v892_v16 = vadd.f32 %v891_v56, %v890_v55  ;;  %v794_v28 = vsub.f32 %v782_v9, %v1363_v35  ;;  %v736_v63 = vsub.f32 %v727_v49, %v1355_v32  ;;  %v740_v40 = vsub.f32 %v731_v50, %v1338_v0 }
 0x172   :  { %v901_v61 = vsub.f32 %v887_v46, %v899_v29  ;;  %v896_v60 = vmul.f32 %v882_v27, %v1436_v48  ;;  %v795_v14 = vmul.f32 %v786_v62, %v786_v62  ;;  %v835_v19 = vmul.f32 %v826_v8, %v1432_v43 }
 0x173   :  { %v905_v54 = vsub.f32 %v892_v16, %v1382_v52  ;;  %v796_v13 = vmul.f32 %v790_v7, %v790_v7  ;;  %v744_v47 = vsub.f32 %v735_v24, %v1342_v1  ;;  %v745_v33 = vmul.f32 %v736_v63, %v736_v63 }
 0x174   :  { %v840_v2 = vmul.f32 %v826_v8, %v1436_v48  ;;  %v897_v20 = vadd.f32 %v896_v60, %v895_v30  ;;  %v798_v51 = vmul.f32 %v794_v28, %v794_v28  ;;  %v746_v21 = vmul.f32 %v740_v40, %v740_v40 }
 0x175   :  { %v910_v49 = vmul.f32 %v901_v61, %v901_v61  ;;  %v797_v57 = vadd.f32 %v796_v13, %v795_v14  ;;  %v831_v0 = vadd.f32 %v830_v44, %v829_v3  ;;  %v836_v46 = vadd.f32 %v835_v19, %v834_v25 }
 0x176   :  { %v911_v50 = vmul.f32 %v905_v54, %v905_v54  ;;  %v747_v16 = vadd.f32 %v746_v21, %v745_v33  ;;  %v748_v27 = vmul.f32 %v744_v47, %v744_v47  ;;  %v841_v58 = vadd.f32 %v840_v2, %v839_v26 }
 0x177   :  { %v907_v52 = vpop.permute.xlu0 %906  ;;  %v1505_v17 = vadd.f32 %v798_v51, %v797_v57  ;;  %v842_v1 = vsub.f32 %v831_v0, %v1363_v35  ;;  %v846_v59 = vsub.f32 %v836_v46, %v1348_v5  ;;  %v610_v30 = vmul.f32 10.0, %v1414_v6  ;;  %v636_v0 = vpop.permute.xlu1 %635 }
 0x178   :  { %v909_v12 = vsub.f32 %v897_v20, %v907_v52  ;;  %v1510_v8 = vadd.f32 %v748_v27, %v747_v16  ;;  %v1658_v9 = vsub.f32 0.0, %v1414_v6  ;;  %v850_v10 = vsub.f32 %v841_v58, %v1366_v38 }
 0x179   :  { %1069 = vrsqrt.f32 %v1505_v17  ;;  %v912_v18 = vadd.f32 %v911_v50, %v910_v49  ;;  %v612_v35 = vmul.f32 %v1414_v6, %v1375_v45  ;;  %v851_v55 = vmul.f32 %v842_v1, %v842_v1 }
 0x17a   :  { %v665_v44 = vmul.f32 10.0, %v1658_v9  ;;  %v913_v53 = vmul.f32 %v909_v12, %v909_v12  ;;  %1071 = vrsqrt.f32 %v1510_v8  ;;  %v852_v5 = vmul.f32 %v846_v59, %v846_v59  ;;  %v1660_v59 = vld [vmem:[#allocation11_spill] sm:$0xff] }
 0x17b   :  { %v1659_v56 = vmov %v1658_v9  ;;  %v517_v3 = vmul.f32 %v1409_v22, %v1430_v42  ;;  %v512_v38 = vmul.f32 %v1409_v22, %v1423_v31  ;;  %v611_v26 = vsub.f32 %v1452_v4, %v610_v30 }
 0x17c   :  { %v667_v23 = vmul.f32 %v1659_v56, %v1375_v45  ;;  %v1522_v24 = vadd.f32 %v913_v53, %v912_v18  ;;  %v666_v25 = vsub.f32 %v1452_v4, %v665_v44  ;;  %v853_v29 = vadd.f32 %v852_v5, %v851_v55 }
 0x17d   :  { %v854_v62 = vmul.f32 %v850_v10, %v850_v10  ;;  %v613_v28 = vsub.f32 %v1427_v37, %v612_v35  ;;  %v518_v63 = vadd.f32 %v517_v3, %v1463_v15  ;;  %v1535_v40 = vmul.f32 %v1427_v37, %v1425_v36 }
 0x17e   :  { %v668_v6 = vsub.f32 %v1427_v37, %v667_v23  ;;  %v519_v4 = vmul.f32 %v1427_v37, %v1432_v43  ;;  %v1543_v14 = vadd.f32 %v512_v38, %v1459_v11  ;;  %v810_v15 = vand.u32 2147483648, %v1505_v17 }
 0x17f   :  { %v594_v7 = vpop.permute.xlu0 %593  ;;  %v1070_v61 = vpop.eup %1069  ;;  %v1538_v60 = vadd.f32 %v854_v62, %v853_v29  ;;  %v760_v47 = vand.u32 2147483648, %v1510_v8  ;;  %1073 = vrsqrt.f32 %v1522_v24  ;;  %vm807_vm13 = vcmp.eq.f32.partialorder %v1505_v17, inf }
 0x180   :  { %v596_v54 = vmul.f32 %v594_v7, %v1380_v34  ;;  %v1072_v19 = vpop.eup %1071  ;;  %v801_v13 = vmul.f32 %v1070_v61, %v1505_v17  ;;  %v1554_v21 = vadd.f32 %v519_v4, %v518_v63  ;;  %vm809_vm14 = vcmp.eq.f32.partialorder %v1505_v17, 0.0  ;;  %v691_v63 = vpop.permute.xlu2 %690 }
 0x181   :  { %v751_v11 = vmul.f32 %v1072_v19, %v1510_v8  ;;  %1075 = vrsqrt.f32 %v1538_v60  ;;  %vm757_vm15 = vcmp.eq.f32.partialorder %v1510_v8, inf  ;;  %vm759_vm0 = vcmp.eq.f32.partialorder %v1510_v8, 0.0 }
 0x182   :  { %v605_v33 = vsub.f32 0.0, %v596_v54  ;;  %v669_v34 = vmul.f32 %v596_v54, %v1375_v45  ;;  %v671_v2 = vmul.f32 %v596_v54, %v1368_v41  ;;  %v673_v20 = vmul.f32 %v596_v54, %v1370_v39 }
 0x183   :  { %v802_v51 = vmul.f32 %v1070_v61, %v801_v13  ;;  %v752_v27 = vmul.f32 %v1072_v19, %v751_v11  ;;  %vm863_vm2 = vcmp.eq.f32.partialorder %v1538_v60, inf  ;;  %vm865_vm3 = vcmp.eq.f32.partialorder %v1538_v60, 0.0 }
 0x184   :  { %v670_v49 = vsub.f32 %v666_v25, %v669_v34  ;;  %v672_v57 = vsub.f32 %v1409_v22, %v671_v2  ;;  %v614_v46 = vmul.f32 %v605_v33, %v1375_v45  ;;  %v616_v50 = vmul.f32 %v605_v33, %v1368_v41 }
 0x185   :  { %v618_v52 = vmul.f32 %v605_v33, %v1370_v39  ;;  %v803_v16 = vmul.f32 0.5, %v802_v51  ;;  %v674_v58 = vsub.f32 %v668_v6, %v673_v20  ;;  %v1566_v9 = vpop.eup %1073  ;;  %v753_v53 = vmul.f32 0.5, %v752_v27 }
 0x186   :  { %v615_v12 = vsub.f32 %v611_v26, %v614_v46  ;;  %v617_v1 = vsub.f32 %v1409_v22, %v616_v50  ;;  %v675_v30 = vmul.f32 %v670_v49, %v1660_v59  ;;  %v676_v45 = vmul.f32 %v672_v57, %v1423_v31  ;;  %v695_v50 = vpop.permute.xlu1 %694 }
 0x187   :  { %v619_v41 = vsub.f32 %v613_v28, %v618_v52  ;;  %v804_v44 = vsub.f32 1.5, %v803_v16  ;;  %v678_v39 = vmul.f32 %v674_v58, %v1425_v36  ;;  %v1574_v5 = vpop.eup %1075  ;;  %v754_v38 = vsub.f32 1.5, %v753_v53  ;;  %v640_v7 = vpop.permute.xlu0 %639 }
 0x188   :  { %v620_v10 = vmul.f32 %v615_v12, %v1660_v59  ;;  %v621_v18 = vmul.f32 %v617_v1, %v1423_v31  ;;  %v625_v35 = vmul.f32 %v615_v12, %v1423_v31  ;;  %v626_v55 = vmul.f32 %v617_v1, %v1430_v42 }
 0x189   :  { %v623_v56 = vmul.f32 %v619_v41, %v1425_v36  ;;  %v628_v23 = vmul.f32 %v619_v41, %v1432_v43  ;;  %v805_v3 = vmul.f32 %v1070_v61, %v804_v44  ;;  %v677_v29 = vadd.f32 %v676_v45, %v675_v30 }
 0x18a   :  { %v622_v25 = vadd.f32 %v621_v18, %v620_v10  ;;  %v627_v26 = vadd.f32 %v626_v55, %v625_v35  ;;  %v680_v62 = vmul.f32 %v670_v49, %v1423_v31  ;;  %v755_v6 = vmul.f32 %v1072_v19, %v754_v38 }
 0x18b   :  { %v806_v28 = vmul.f32 %v805_v3, %v1505_v17  ;;  %v681_v54 = vmul.f32 %v672_v57, %v1430_v42  ;;  %v683_v4 = vmul.f32 %v674_v58, %v1432_v43  ;;  %v679_v34 = vadd.f32 %v678_v39, %v677_v29 }
 0x18c   :  { %v624_v13 = vadd.f32 %v623_v56, %v622_v25  ;;  %v629_v33 = vadd.f32 %v628_v23, %v627_v26  ;;  %v685_v61 = vmul.f32 %v670_v49, %v1425_v36  ;;  %v756_v31 = vmul.f32 %v755_v6, %v1510_v8 }
 0x18d   :  { %v808_v2 = vsel %vm807_vm13, %v1505_v17, %v806_v28  ;;  %v682_v20 = vadd.f32 %v681_v54, %v680_v62  ;;  %v686_v51 = vmul.f32 %v672_v57, %v1432_v43  ;;  %v693_v46 = vsub.f32 %v679_v34, %v691_v63 }
 0x18e   :  { %v638_v19 = vsub.f32 %v624_v13, %v636_v0  ;;  %v642_v11 = vsub.f32 %v629_v33, %v640_v7  ;;  %v811_v42 = vsel %vm809_vm14, %v810_v15, %v808_v2  ;;  %v758_v49 = vsel %vm757_vm15, %v1510_v8, %v756_v31  ;;  %v1601_v15 = vld [vmem:[#allocation5] sm:$0xff] }
 0x18f   :  { %813 = vrot.lane.b32.xlu1 %v811_v42, %s1195_s27  ;;  %v684_v52 = vadd.f32 %v683_v4, %v682_v20  ;;  %v687_v16 = vadd.f32 %v686_v51, %v685_v61  ;;  %v688_v27 = vmul.f32 %v674_v58, %v1436_v48  ;;  %v761_v17 = vsel %vm759_vm0, %v760_v47, %v758_v49 }
 0x190   :  { %v647_v57 = vmul.f32 %v638_v19, %v638_v19  ;;  %v648_v0 = vmul.f32 %v642_v11, %v642_v11  ;;  %v527_v59 = vsub.f32 %v1554_v21, %v1601_v15  ;;  %763 = vrot.lane.b32.xlu2 %v761_v17, %s1195_s27  ;;  %v702_v30 = vmul.f32 %v693_v46, %v693_v46 }
 0x191   :  { %v689_v45 = vadd.f32 %v688_v27, %v687_v16  ;;  %v697_v44 = vsub.f32 %v684_v52, %v695_v50  ;;  %v857_v58 = vmul.f32 %v1574_v5, %v1538_v60  ;;  %v630_v39 = vmul.f32 %v615_v12, %v1425_v36  ;;  %v644_v12 = vpop.permute.xlu0 %643 }
 0x192   :  { %v649_v53 = vadd.f32 %v648_v0, %v647_v57  ;;  %v631_v10 = vmul.f32 %v617_v1, %v1432_v43  ;;  %v633_v21 = vmul.f32 %v619_v41, %v1436_v48  ;;  %v916_v55 = vmul.f32 %v1566_v9, %v1522_v24 }
 0x193   :  { %v701_v8 = vsub.f32 %v689_v45, %v1355_v32  ;;  %v703_v47 = vmul.f32 %v697_v44, %v697_v44  ;;  %v858_v18 = vmul.f32 %v1574_v5, %v857_v58  ;;  %v1617_v56 = vadd.f32 %v1535_v40, %v1543_v14  ;;  %v1661_v14 = vld [vmem:[#allocation12_spill] sm:$0xff] }
 0x194   :  { %v632_v35 = vadd.f32 %v631_v10, %v630_v39  ;;  %v530_v1 = vmul.f32 %v527_v59, %v527_v59  ;;  %v917_v32 = vmul.f32 %v1566_v9, %v916_v55  ;;  %v522_v41 = vmul.f32 %v1409_v22, %v1432_v43 }
 0x195   :  { %v704_v23 = vadd.f32 %v703_v47, %v702_v30  ;;  %v705_v3 = vmul.f32 %v701_v8, %v701_v8  ;;  %v859_v36 = vmul.f32 0.5, %v858_v18  ;;  %v524_v54 = vmul.f32 %v1427_v37, %v1436_v48 }
 0x196   :  { %v634_v38 = vadd.f32 %v633_v21, %v632_v35  ;;  %v918_v62 = vmul.f32 0.5, %v917_v32  ;;  %v523_v7 = vadd.f32 %v522_v41, %v1661_v14  ;;  %v866_v4 = vand.u32 2147483648, %v1538_v60 }
 0x197   :  { %v706_v25 = vadd.f32 %v705_v3, %v704_v23  ;;  %v860_v26 = vsub.f32 1.5, %v859_v36  ;;  %532 = vrot.lane.b32.xlu1 %v530_v1, %s1195_s27  ;;  %vm922_vm4 = vcmp.eq.f32.partialorder %v1522_v24, inf  ;;  %v925_v37 = vand.u32 2147483648, %v1522_v24 }
 0x198   :  { %v646_v29 = vsub.f32 %v634_v38, %v644_v12  ;;  %v919_v6 = vsub.f32 1.5, %v918_v62  ;;  %vm924_vm5 = vcmp.eq.f32.partialorder %v1522_v24, 0.0  ;;  %v526_v18 = vsub.f32 %v1617_v56, %v1601_v15 }
 0x199   :  { %v861_v40 = vmul.f32 %v1574_v5, %v860_v26  ;;  %1077 = vrsqrt.f32 %v706_v25  ;;  %v525_v5 = vadd.f32 %v524_v54, %v523_v7  ;;  %vm714_vm6 = vcmp.eq.f32.partialorder %v706_v25, inf }
 0x19a   :  { %v650_v28 = vmul.f32 %v646_v29, %v646_v29  ;;  %v920_v22 = vmul.f32 %v1566_v9, %v919_v6  ;;  %v717_v17 = vand.u32 2147483648, %v706_v25  ;;  %vm716_vm1 = vcmp.eq.f32.partialorder %v706_v25, 0.0 }
 0x19b   :  { %v862_v63 = vmul.f32 %v861_v40, %v1538_v60  ;;  %v529_v23 = vmul.f32 %v526_v18, %v526_v18  ;;  %v1206_v3 = vmov 0.0   ;;  %vm557_vm15 = vcmask 97368  }
 0x19c   :  { %v651_v13 = vadd.f32 %v650_v28, %v649_v53  ;;  %v921_v34 = vmul.f32 %v920_v22, %v1522_v24 }
 0x19d   :  { %v864_v43 = vsel %vm863_vm2, %v1538_v60, %v862_v63  ;;  %v528_v60 = vsub.f32 %v525_v5, %v1601_v15 }
 0x19e   :  { %v867_v33 = vsel %vm865_vm3, %v866_v4, %v864_v43  ;;  %1079 = vrsqrt.f32 %v651_v13  ;;  %v923_v48 = vsel %vm922_vm4, %v1522_v24, %v921_v34  ;;  %vm659_vm7 = vcmp.eq.f32.partialorder %v651_v13, inf }
 0x19f   :  { %v1078_v61 = vpop.eup %1077  ;;  %869 = vrot.lane.b32.xlu0 %v867_v33, %s1205_s9  ;;  %v926_v2 = vsel %vm924_vm5, %v925_v37, %v923_v48  ;;  %v536_v19 = vmul.f32 %v528_v60, %v528_v60  ;;  %v662_v0 = vand.u32 2147483648, %v651_v13  ;;  %vm661_vm8 = vcmp.eq.f32.partialorder %v651_v13, 0.0 }
 0x1a0   :  { %v708_v9 = vmul.f32 %v1078_v61, %v706_v25  ;;  %928 = vrot.lane.b32.xlu2 %v926_v2, %s1205_s9 }
 0x1a2   :  { %v709_v31 = vmul.f32 %v1078_v61, %v708_v9 }
 0x1a4   :  { %v1080_v20 = vpop.eup %1079  ;;  %v710_v51 = vmul.f32 0.5, %v709_v31 }
 0x1a5   :  { %v653_v11 = vmul.f32 %v1080_v20, %v651_v13 }
 0x1a6   :  { %v711_v42 = vsub.f32 1.5, %v710_v51 }
 0x1a7   :  { %538 = vrot.lane.b32.xlu0 %v536_v19, %s1205_s9  ;;  %v654_v46 = vmul.f32 %v1080_v20, %v653_v11 }
 0x1a8   :  { %v712_v50 = vmul.f32 %v1078_v61, %v711_v42 }
 0x1a9   :  { %v655_v49 = vmul.f32 0.5, %v654_v46 }
 0x1aa   :  { %v713_v16 = vmul.f32 %v712_v50, %v706_v25 }
 0x1ab   :  { %v656_v52 = vsub.f32 1.5, %v655_v49 }
 0x1ac   :  { %v715_v57 = vsel %vm714_vm6, %v706_v25, %v713_v16 }
 0x1ad   :  { %v657_v27 = vmul.f32 %v1080_v20, %v656_v52  ;;  %v718_v45 = vsel %vm716_vm1, %v717_v17, %v715_v57 }
 0x1af   :  { %v658_v24 = vmul.f32 %v657_v27, %v651_v13 }
 0x1b1   :  { %v660_v59 = vsel %vm659_vm7, %v651_v13, %v658_v24 }
 0x1b2   :  { %v663_v30 = vsel %vm661_vm8, %v662_v0, %v660_v59 }
 0x1b3   :  { %v719_v44 = vadd.f32 %v718_v45, %v663_v30 }
 0x1ea   :  { %v764_v58 = vpop.permute.xlu2 %763 }
 0x1eb   :  { %v766_v39 = vadd.f32 %v764_v58, %v719_v44 }
 0x1fa   :  { %v929_v21 = vpop.permute.xlu2 %928 }
 0x201   :  { %v814_v53 = vpop.permute.xlu1 %813 }
 0x202   :  { %v816_v10 = vadd.f32 %v814_v53, %v766_v39 }
 0x209   :  { %v533_v55 = vpop.permute.xlu1 %532 }
 0x20a   :  { %v535_v1 = vadd.f32 %v533_v55, %v529_v23 }
 0x211   :  { %v870_v8 = vpop.permute.xlu0 %869 }
 0x212   :  { %v872_v47 = vadd.f32 %v870_v8, %v816_v10 }
 0x214   :  { %v931_v35 = vadd.f32 %v929_v21, %v872_v47 }
 0x216   :  { %vm932_vm9 = vcmp.ne.f32.partialorder %v931_v35, 0.0  ;;  %v943_v29 = vsel %vm935_vm10, %v931_v35, 0.0 }
 0x217   :  { %v1007_v36 = vsel %vm932_vm9, 1.0, %v1206_v3  ;;  %v944_v15 = vrot.slane %v943_v29, 4  ;;  %vm980_vm9 = vcmask 0  }
 0x218   :  { %v936_v12 = vsel %vm935_vm10, %v1007_v36, 0.0 }
 0x219   :  { %v937_v38 = vrot.slane %v936_v12, 4  ;;  %v539_v32 = vpop.permute.xlu0 %538  ;;  %v945_v28 = vadd.f32 %v944_v15, %v943_v29 }
 0x21a   :  { %v541_v25 = vadd.f32 %v539_v32, %v535_v1 }
 0x21b   :  { %v938_v26 = vadd.f32 %v937_v38, %v936_v12  ;;  %v946_v4 = vrot.slane %v945_v28, 2 }
 0x21c   :  { %1081 = vrsqrt.f32 %v541_v25  ;;  %vm549_vm11 = vcmp.eq.f32.partialorder %v541_v25, inf  ;;  %v552_v61 = vand.u32 2147483648, %v541_v25  ;;  %vm551_vm12 = vcmp.eq.f32.partialorder %v541_v25, 0.0 }
 0x21d   :  { %v939_v41 = vrot.slane %v938_v26, 2  ;;  %v947_v5 = vadd.f32 %v946_v4, %v945_v28 }
 0x21f   :  { %v940_v62 = vadd.f32 %v939_v41, %v938_v26  ;;  %v948_v9 = vrot.slane %v947_v5, 1 }
 0x221   :  { %v941_v40 = vrot.slane %v940_v62, 1  ;;  %v949_v50 = vadd.f32 %v948_v9, %v947_v5 }
 0x222   :  { %v1082_v56 = vpop.eup %1081 }
 0x223   :  { %v942_v14 = vadd.f32 %v941_v40, %v940_v62  ;;  %v543_v7 = vmul.f32 %v1082_v56, %v541_v25 }
 0x225   :  { %v950_v6 = vadd.f32 1.0, %v942_v14  ;;  %v544_v63 = vmul.f32 %v1082_v56, %v543_v7 }
 0x227   :  { %1083 = vrcp.f32 %v950_v6  ;;  %v545_v54 = vmul.f32 0.5, %v544_v63  ;;  %v962_v2 = vand.u32 2147483648, %v950_v6  ;;  %v960_v20 = vand.u32 2147483647, %v950_v6 }
 0x228   :  { %vm956_vm0 = vweird.f32 %v950_v6 }
 0x229   :  { %v546_v13 = vsub.f32 1.5, %v545_v54  ;;  %v963_v42 = vor.u32 1.1754944e-38, %v962_v2  ;;  %vm961_vm3 = vcmp.eq.f32.partialorder %v960_v20, 8.507059e+37 }
 0x22b   :  { %v547_v22 = vmul.f32 %v1082_v56, %v546_v13 }
 0x22d   :  { %v1084_v43 = vpop.eup %1083  ;;  %v548_v34 = vmul.f32 %v547_v22, %v541_v25 }
 0x22e   :  { %v952_v33 = vmul.f32 %v1084_v43, %v950_v6  ;;  %vm957_vm13 = vweird.f32 %v1084_v43 }
 0x22f   :  { %v550_v48 = vsel %vm549_vm11, %v541_v25, %v548_v34  ;;  %vm958_vm2 = vmor %vm956_vm0, %vm957_vm13 }
 0x230   :  { %v953_v37 = vsub.f32 1.0, %v952_v33  ;;  %v553_v60 = vsel %vm551_vm12, %v552_v61, %v550_v48 }
 0x231   :  { %vm554_vm14 = vcmp.ne.f32.partialorder %v553_v60, 0.0  ;;  %v565_v0 = vsel %vm557_vm15, %v553_v60, 0.0 }
 0x232   :  { %v954_v31 = vmul.f32 %v1084_v43, %v953_v37  ;;  %v1006_v51 = vsel %vm554_vm14, 1.0, %v1206_v3  ;;  %v566_v59 = vrot.slane %v565_v0, 4 }
 0x233   :  { %v558_v11 = vsel %vm557_vm15, %v1006_v51, 0.0 }
 0x234   :  { %v955_v19 = vadd.f32 %v1084_v43, %v954_v31  ;;  %v559_v46 = vrot.slane %v558_v11, 4  ;;  %v567_v44 = vadd.f32 %v566_v59, %v565_v0 }
 0x236   :  { %v959_v49 = vsel %vm958_vm2, %v1084_v43, %v955_v19  ;;  %v560_v16 = vadd.f32 %v559_v46, %v558_v11  ;;  %v568_v58 = vrot.slane %v567_v44, 2 }
 0x237   :  { %v964_v52 = vsel %vm961_vm3, %v963_v42, %v959_v49 }
 0x238   :  { %v965_v27 = vmul.f32 %v964_v52, %v949_v50  ;;  %v561_v24 = vrot.slane %v560_v16, 2  ;;  %v569_v39 = vadd.f32 %v568_v58, %v567_v44 }
 0x23a   :  { %967 = vrot.lane.b32.xlu2 %v965_v27, %s1207_s10  ;;  %v562_v57 = vadd.f32 %v561_v24, %v560_v16  ;;  %v570_v18 = vrot.slane %v569_v39, 1 }
 0x23c   :  { %v563_v17 = vrot.slane %v562_v57, 1  ;;  %v571_v3 = vadd.f32 %v570_v18, %v569_v39 }
 0x23e   :  { %v564_v30 = vadd.f32 %v563_v17, %v562_v57 }
 0x240   :  { %v572_v45 = vadd.f32 1.0, %v564_v30 }
 0x242   :  { %1085 = vrcp.f32 %v572_v45  ;;  %v584_v47 = vand.u32 2147483648, %v572_v45  ;;  %v582_v35 = vand.u32 2147483647, %v572_v45  ;;  %vm578_vm5 = vweird.f32 %v572_v45 }
 0x244   :  { %v585_v23 = vor.u32 1.1754944e-38, %v584_v47  ;;  %vm583_vm7 = vcmp.eq.f32.partialorder %v582_v35, 8.507059e+37 }
 0x248   :  { %v1086_v53 = vpop.eup %1085 }
 0x249   :  { %v574_v10 = vmul.f32 %v1086_v53, %v572_v45  ;;  %vm579_vm4 = vweird.f32 %v1086_v53 }
 0x24a   :  { %vm580_vm6 = vmor %vm578_vm5, %vm579_vm4 }
 0x24b   :  { %v575_v8 = vsub.f32 1.0, %v574_v10 }
 0x24d   :  { %v576_v21 = vmul.f32 %v1086_v53, %v575_v8 }
 0x24f   :  { %v577_v55 = vadd.f32 %v1086_v53, %v576_v21 }
 0x251   :  { %v581_v36 = vsel %vm580_vm6, %v1086_v53, %v577_v55 }
 0x252   :  { %v586_v12 = vsel %vm583_vm7, %v585_v23, %v581_v36 }
 0x253   :  { %v587_v1 = vmul.f32 %v586_v12, %v571_v3 }
 0x294   :  { %v968_v38 = vpop.permute.xlu2 %967 }
 0x295   :  { %v970_v32 = vadd.f32 %v968_v38, %v587_v1 }
 0x297   :  { %vm971_vm8 = vcmp.ne.f32.partialorder %v970_v32, %v970_v32 }
 0x298   :  { %v972_v25 = vsel %vm971_vm8, 0.0, %v970_v32 }
 0x299   :  { %v973_v26 = vand.u32 2147483647, %v972_v25 }
 0x29b   :  { %vm974_vm1 = vcmp.eq.f32.partialorder %v973_v26, inf }
 0x29c   :  { %v975_v41 = vsel %vm974_vm1, 1.0, %v972_v25 }
 0x29d   :  { %977 = vrot.lane.b32.xlu1 %v975_v41, %s1208_s11 }
 0x30f   :  { %v978_v29 = vpop.permute.xlu1 %977 }
 0x310   :  { %981 = vst.msk [vmem:[#allocation7] sm:$0x1] %vm980_vm9, %v978_v29 }
 0x311   :  { %992 = dma.vmem_to_hbm [thread:$0]  %s988_s13, 16, %s990_s16, [#allocation4]  }
 0x312   :  { %1164 = dma.done.wait [#allocation4], 16  }
 0x313   :  { %1165 = vsyncadd [#allocation4], 4294967280 }
 0x314   :  { %997 = vsyncpa [#allocation3], 1 }
 0x315   :  { %998 = vsyncpa [#allocation6], 1 }
 0x316   :  { %999 = vsyncpa [#allocation4], 1 }

</bundles_post_ra>
